<compile_context>
chip_gen: v7x
topology: tpu7x:2x2x1
jax: 0.10.0
libtpu: 0.0.40
codegen_flags: <defaults>
</compile_context>

<pallas_src>
import jax
import jax.numpy as jnp
from jax.experimental import pallas as pl
from jax.experimental.pallas import tpu as pltpu

# ----------------------------- configs (synthetic) ---------------------------
BATCH = 2          # self.batch
N_J = 8            # configs.n_j  (number of jobs / decoding steps)
FEAT = 4           # per-task feature dim carried in `data`
HIDDEN = 32        # hidden_dim
N_NODES = 2 * N_J  # tasks_per_node = np.zeros(configs.n_j * 2)
LANES = 128        # packed output slab width (lane-dense stores / DMAs)

# packed float-output column layout
_COL_TPRO = 0                 # [0, N_J)      task_action_pro
_COL_PPRO = N_J               # [N_J, 2*N_J)  place_action_pro
_COL_REW = 2 * N_J            # rewards (per batch row)
_COL_LBE = 2 * N_J + 1        # load_balancing_eff (row 0)
_COL_ENERGY = 2 * N_J + 2     # total_energy_consumption (row 0)


def actor_critic_kernel(data_ref, enc_ref, node_ref, outf_ref, outi_ref):
    B, NJ, F = data_ref.shape
    H = enc_ref.shape[1]
    NP = node_ref.shape[1]

    data = data_ref[...]                      # (B, NJ, F)
    enc = enc_ref[...]                        # (F+3, H): w1 | b1 | w2 | b2@lane0
    node = node_ref[...]                      # (3, NP):  speed | bias_p | ecoef

    b1 = enc[F:F + 1]                         # (1, H)
    w2 = enc[F + 1:F + 2]                     # (1, H)
    b2 = enc[F + 2:F + 3, 0:1]                # (1, 1)

    # hoisted (B, NP) broadcasts of per-node parameters (no per-step re-broadcast)
    speed_b = jnp.broadcast_to(node[0:1], (B, NP))
    bias_b = jnp.broadcast_to(node[1:2], (B, NP))
    ecoef_b = jnp.broadcast_to(node[2:3], (B, NP))

    # --- task_actor encoder: F=4 contraction unrolled as broadcast FMAs (VPU) ---
    acc = b1 + data[:, :, 0:1] * enc[0:1]
    for f in range(1, F):
        acc = acc + data[:, :, f:f + 1] * enc[f:f + 1]
    h3 = jnp.tanh(acc)                                        # (B, NJ, H)
    logits_all = jnp.sum(h3 * w2, axis=-1) + b2               # (B, NJ)

    # per-task base processing time (env.reset analogue)
    pt_all = jnp.abs(data[:, :, 0]) + jnp.float32(0.1)        # (B, NJ)

    # rollout state (carried through the unrolled decoding loop)
    mask = jnp.zeros((B, NJ), jnp.float32)
    place_time = jnp.zeros((B, NP), jnp.float32)
    tpn = jnp.zeros((1, NP), jnp.float32)                     # tasks_per_node
    rewards = jnp.zeros((B, 1), jnp.float32)
    energy = jnp.zeros((1, 1), jnp.float32)
    fslab = jnp.zeros((B, LANES), jnp.float32)                # packed float outputs
    islab = jnp.zeros((B, LANES), jnp.int32)                  # packed int outputs

    iota_nj = jax.lax.broadcasted_iota(jnp.int32, (B, NJ), 1)
    iota_np = jax.lax.broadcasted_iota(jnp.int32, (B, NP), 1)
    lane = jax.lax.broadcasted_iota(jnp.int32, (B, LANES), 1)

    NEG = jnp.float32(-1e9)
    one = jnp.float32(1.0)

    for i in range(NJ):
        # ---------------- task actor: greedy pointer on masked logits --------
        masked = jnp.where(mask > 0.5, NEG, logits_all)
        mx = jnp.max(masked, axis=-1, keepdims=True)
        # int32 iota tie-break; argmax(softmax(x)) == argmax(x)
        a_i = jnp.min(jnp.where(masked >= mx, iota_nj, NJ),
                      axis=-1, keepdims=True)                 # (B, 1) int32
        onehot_t = (iota_nj == a_i).astype(jnp.float32)       # (B, NJ)
        # chosen prob = exp(mx - mx) / sum(exp(masked - mx)) = 1 / sum_e
        sum_e = jnp.sum(jnp.exp(masked - mx), axis=-1, keepdims=True)
        chosen_p = jnp.minimum(pl.reciprocal(sum_e, approx=True), one)
        proc_t = jnp.sum(onehot_t * pt_all, axis=-1, keepdims=True)

        # ---------------- place actor: greedy pointer over nodes -------------
        plog = bias_b - (place_time + proc_t * speed_b)       # (B, NP)
        pmx = jnp.max(plog, axis=-1, keepdims=True)
        pa_i = jnp.min(jnp.where(plog >= pmx, iota_np, NP),
                       axis=-1, keepdims=True)                # (B, 1) int32
        onehot_p = (iota_np == pa_i).astype(jnp.float32)      # (B, NP)
        sum_pe = jnp.sum(jnp.exp(plog - pmx), axis=-1, keepdims=True)
        chosen_pp = jnp.minimum(pl.reciprocal(sum_pe, approx=True), one)

        # ---------------- env.step bookkeeping --------------------------------
        speed_g = jnp.sum(onehot_p * speed_b, axis=-1, keepdims=True)
        completion = proc_t * speed_g                          # (B, 1)
        mask = mask + onehot_t
        place_time = place_time + onehot_p * completion
        tpn = tpn + jnp.sum(onehot_p, axis=0, keepdims=True)
        rewards = rewards - completion
        ecoef_g = jnp.sum(onehot_p * ecoef_b, axis=-1, keepdims=True)
        energy = energy + jnp.sum(completion * ecoef_g, axis=0, keepdims=True)

        # ---------------- write step-i columns into packed slabs --------------
        fslab = fslab + jnp.where(lane == _COL_TPRO + i, chosen_p,
                                  jnp.where(lane == _COL_PPRO + i, chosen_pp,
                                            jnp.float32(0.0)))
        islab = jnp.where(lane == _COL_TPRO + i, a_i, islab)
        islab = jnp.where(lane == _COL_PPRO + i, pa_i, islab)

    # ---------------- calculate_load_balance_efficiency (CV %) ----------------
    m = jnp.sum(tpn, axis=1, keepdims=True)                    # (1, 1)
    avg = m / jnp.float32(NP)
    sq = jnp.sum((tpn - avg) ** 2, axis=1, keepdims=True)
    cv = jnp.sqrt(sq / jnp.float32(NP)) / avg * jnp.float32(100.0)

    fslab = fslab + jnp.where(lane == _COL_REW, rewards, jnp.float32(0.0))
    fslab = fslab + jnp.where(lane == _COL_LBE, cv, jnp.float32(0.0))
    fslab = fslab + jnp.where(lane == _COL_ENERGY, energy, jnp.float32(0.0))

    # single dense (lane-wide) store per output slab
    outf_ref[...] = fslab
    outi_ref[...] = islab


def actor_critic_forward(data, params):
    B, NJ, _ = data.shape
    H = params["w1"].shape[1]
    NP = params["speed"].shape[1]
    assert 2 * NJ + 3 <= LANES

    # pack 8 parameter tensors into 2 buffers (fewer DMAs / descriptors)
    enc = jnp.concatenate(
        [params["w1"], params["b1"], params["w2"],
         jnp.pad(params["b2"], ((0, 0), (0, H - 1)))],
        axis=0).astype(jnp.float32)                            # (F+3, H)
    node = jnp.concatenate(
        [params["speed"], params["bias_p"], params["ecoef"]],
        axis=0).astype(jnp.float32)                            # (3, NP)

    vmem = lambda: pl.BlockSpec(memory_space=pltpu.MemorySpace.VMEM)

    outf, outi = pl.pallas_call(
        actor_critic_kernel,
        out_shape=(
            jax.ShapeDtypeStruct((B, LANES), jnp.float32),     # packed float outputs
            jax.ShapeDtypeStruct((B, LANES), jnp.int32),       # packed int outputs
        ),
        in_specs=[vmem(), vmem(), vmem()],
        out_specs=(vmem(), vmem()),
        compiler_params=pltpu.CompilerParams(
            vmem_limit_bytes=8 * 1024 * 1024),
        cost_estimate=pl.CostEstimate(
            flops=16384, transcendentals=1024, bytes_accessed=4096),
    )(data, enc, node)

    task_seq = outi[:, _COL_TPRO:_COL_TPRO + NJ]
    place_seq = outi[:, _COL_PPRO:_COL_PPRO + NJ]
    task_pro = outf[:, _COL_TPRO:_COL_TPRO + NJ]
    place_pro = outf[:, _COL_PPRO:_COL_PPRO + NJ]
    rewards = outf[:, _COL_REW:_COL_REW + 1]
    lbe = outf[0:1, _COL_LBE:_COL_LBE + 1]
    energy = outf[0:1, _COL_ENERGY:_COL_ENERGY + 1]
    return task_seq, place_seq, task_pro, place_pro, rewards, lbe, energy


def init_params(key):
    ks = jax.random.split(key, 6)
    return {
        "w1": (0.5 * jax.random.normal(ks[0], (FEAT, HIDDEN))).astype(jnp.float32),
        "b1": jnp.zeros((1, HIDDEN), jnp.float32),
        "w2": (0.5 * jax.random.normal(ks[1], (1, HIDDEN))).astype(jnp.float32),
        "b2": jnp.zeros((1, 1), jnp.float32),
        "speed": jax.random.uniform(ks[2], (1, N_NODES), jnp.float32, 0.5, 1.5),
        "bias_p": (0.1 * jax.random.normal(ks[3], (1, N_NODES))).astype(jnp.float32),
        "ecoef": jax.random.uniform(ks[4], (1, N_NODES), jnp.float32, 0.1, 1.0),
    }


if __name__ == "__main__":
    key = jax.random.PRNGKey(0)
    k_data, k_params = jax.random.split(key)
    data = jax.random.normal(k_data, (BATCH, N_J, FEAT), jnp.float32)
    params = init_params(k_params)

    outs = actor_critic_forward(data, params)
    outs = jax.block_until_ready(outs)

    (task_seq, place_seq, task_pro, place_pro, rewards, lbe, energy) = outs
    assert task_seq.shape == (BATCH, N_J) and task_seq.dtype == jnp.int32
    assert place_seq.shape == (BATCH, N_J) and place_seq.dtype == jnp.int32
    assert task_pro.shape == (BATCH, N_J) and place_pro.shape == (BATCH, N_J)
    assert rewards.shape == (BATCH, 1)
    assert lbe.shape == (1, 1) and energy.shape == (1, 1)
    # probabilities must be in (0, 1]; each job index selected exactly once
    assert bool(jnp.all(task_pro > 0) & jnp.all(task_pro <= 1.0))
    assert bool(jnp.all(jnp.sort(task_seq, axis=1) == jnp.arange(N_J)[None, :]))

    print("KERNEL_OK")
</pallas_src>

<mosaic_0001>
module attributes {stable_mosaic.version = 11 : i64} {
  func.func @actor_critic_kernel(%arg0: memref<2x8x4xf32, #tpu.memory_space<vmem>>, %arg1: memref<7x32xf32, #tpu.memory_space<vmem>>, %arg2: memref<3x16xf32, #tpu.memory_space<vmem>>, %arg3: memref<2x128xf32, #tpu.memory_space<vmem>>, %arg4: memref<2x128xi32, #tpu.memory_space<vmem>>) attributes {dimension_semantics = [], scalar_prefetch = 0 : i64, scratch_operands = 0 : i64, tpu.core_type = #tpu.core_type<tc>} {
    %c0 = arith.constant 0 : index
    %c0_0 = arith.constant 0 : index
    %c0_1 = arith.constant 0 : index
    %0 = vector.load %arg0[%c0, %c0_0, %c0_1] : memref<2x8x4xf32, #tpu.memory_space<vmem>>, vector<2x8x4xf32>
    %c0_2 = arith.constant 0 : index
    %c0_3 = arith.constant 0 : index
    %1 = vector.load %arg1[%c0_2, %c0_3] : memref<7x32xf32, #tpu.memory_space<vmem>>, vector<7x32xf32>
    %c0_4 = arith.constant 0 : index
    %c0_5 = arith.constant 0 : index
    %2 = vector.load %arg2[%c0_4, %c0_5] : memref<3x16xf32, #tpu.memory_space<vmem>>, vector<3x16xf32>
    %3 = vector.extract_strided_slice %1 {offsets = [4, 0], sizes = [1, 32], strides = [1, 1]} : vector<7x32xf32> to vector<1x32xf32>
    %4 = vector.extract_strided_slice %1 {offsets = [5, 0], sizes = [1, 32], strides = [1, 1]} : vector<7x32xf32> to vector<1x32xf32>
    %5 = vector.extract_strided_slice %1 {offsets = [6, 0], sizes = [1, 1], strides = [1, 1]} : vector<7x32xf32> to vector<1x1xf32>
    %6 = vector.extract_strided_slice %2 {offsets = [0, 0], sizes = [1, 16], strides = [1, 1]} : vector<3x16xf32> to vector<1x16xf32>
    %7 = vector.shape_cast %6 : vector<1x16xf32> to vector<1x16xf32>
    %8 = vector.broadcast %7 : vector<1x16xf32> to vector<2x16xf32>
    %9 = vector.extract_strided_slice %2 {offsets = [1, 0], sizes = [1, 16], strides = [1, 1]} : vector<3x16xf32> to vector<1x16xf32>
    %10 = vector.shape_cast %9 : vector<1x16xf32> to vector<1x16xf32>
    %11 = vector.broadcast %10 : vector<1x16xf32> to vector<2x16xf32>
    %12 = vector.extract_strided_slice %2 {offsets = [2, 0], sizes = [1, 16], strides = [1, 1]} : vector<3x16xf32> to vector<1x16xf32>
    %13 = vector.shape_cast %12 : vector<1x16xf32> to vector<1x16xf32>
    %14 = vector.broadcast %13 : vector<1x16xf32> to vector<2x16xf32>
    %15 = vector.extract_strided_slice %0 {offsets = [0, 0, 0], sizes = [2, 8, 1], strides = [1, 1, 1]} : vector<2x8x4xf32> to vector<2x8x1xf32>
    %16 = vector.extract_strided_slice %1 {offsets = [0, 0], sizes = [1, 32], strides = [1, 1]} : vector<7x32xf32> to vector<1x32xf32>
    %17 = vector.shape_cast %16 : vector<1x32xf32> to vector<1x1x32xf32>
    %18 = vector.broadcast %15 : vector<2x8x1xf32> to vector<2x8x32xf32>
    %19 = vector.broadcast %17 : vector<1x1x32xf32> to vector<2x8x32xf32>
    %20 = arith.mulf %18, %19 : vector<2x8x32xf32>
    %21 = vector.shape_cast %3 : vector<1x32xf32> to vector<1x1x32xf32>
    %22 = vector.broadcast %21 : vector<1x1x32xf32> to vector<2x8x32xf32>
    %23 = arith.addf %22, %20 : vector<2x8x32xf32>
    %24 = vector.extract_strided_slice %0 {offsets = [0, 0, 1], sizes = [2, 8, 1], strides = [1, 1, 1]} : vector<2x8x4xf32> to vector<2x8x1xf32>
    %25 = vector.extract_strided_slice %1 {offsets = [1, 0], sizes = [1, 32], strides = [1, 1]} : vector<7x32xf32> to vector<1x32xf32>
    %26 = vector.shape_cast %25 : vector<1x32xf32> to vector<1x1x32xf32>
    %27 = vector.broadcast %24 : vector<2x8x1xf32> to vector<2x8x32xf32>
    %28 = vector.broadcast %26 : vector<1x1x32xf32> to vector<2x8x32xf32>
    %29 = arith.mulf %27, %28 : vector<2x8x32xf32>
    %30 = arith.addf %23, %29 : vector<2x8x32xf32>
    %31 = vector.extract_strided_slice %0 {offsets = [0, 0, 2], sizes = [2, 8, 1], strides = [1, 1, 1]} : vector<2x8x4xf32> to vector<2x8x1xf32>
    %32 = vector.extract_strided_slice %1 {offsets = [2, 0], sizes = [1, 32], strides = [1, 1]} : vector<7x32xf32> to vector<1x32xf32>
    %33 = vector.shape_cast %32 : vector<1x32xf32> to vector<1x1x32xf32>
    %34 = vector.broadcast %31 : vector<2x8x1xf32> to vector<2x8x32xf32>
    %35 = vector.broadcast %33 : vector<1x1x32xf32> to vector<2x8x32xf32>
    %36 = arith.mulf %34, %35 : vector<2x8x32xf32>
    %37 = arith.addf %30, %36 : vector<2x8x32xf32>
    %38 = vector.extract_strided_slice %0 {offsets = [0, 0, 3], sizes = [2, 8, 1], strides = [1, 1, 1]} : vector<2x8x4xf32> to vector<2x8x1xf32>
    %39 = vector.extract_strided_slice %1 {offsets = [3, 0], sizes = [1, 32], strides = [1, 1]} : vector<7x32xf32> to vector<1x32xf32>
    %40 = vector.shape_cast %39 : vector<1x32xf32> to vector<1x1x32xf32>
    %41 = vector.broadcast %38 : vector<2x8x1xf32> to vector<2x8x32xf32>
    %42 = vector.broadcast %40 : vector<1x1x32xf32> to vector<2x8x32xf32>
    %43 = arith.mulf %41, %42 : vector<2x8x32xf32>
    %44 = arith.addf %37, %43 : vector<2x8x32xf32>
    %45 = math.tanh %44 : vector<2x8x32xf32>
    %46 = vector.shape_cast %4 : vector<1x32xf32> to vector<1x1x32xf32>
    %47 = vector.broadcast %46 : vector<1x1x32xf32> to vector<2x8x32xf32>
    %48 = arith.mulf %45, %47 : vector<2x8x32xf32>
    %cst = arith.constant dense<0.000000e+00> : vector<2x8xf32>
    %49 = vector.multi_reduction <add>, %48, %cst [2] : vector<2x8x32xf32> to vector<2x8xf32>
    %50 = vector.broadcast %5 : vector<1x1xf32> to vector<2x8xf32>
    %51 = arith.addf %49, %50 : vector<2x8xf32>
    %52 = vector.extract_strided_slice %0 {offsets = [0, 0, 0], sizes = [2, 8, 1], strides = [1, 1, 1]} : vector<2x8x4xf32> to vector<2x8x1xf32>
    %53 = vector.shape_cast %52 : vector<2x8x1xf32> to vector<2x8xf32>
    %54 = math.absf %53 : vector<2x8xf32>
    %cst_6 = arith.constant 1.000000e-01 : f32
    %55 = vector.broadcast %cst_6 : f32 to vector<2x8xf32>
    %56 = arith.addf %54, %55 : vector<2x8xf32>
    %cst_7 = arith.constant 0.000000e+00 : f32
    %57 = vector.broadcast %cst_7 : f32 to vector<2x8xf32>
    %cst_8 = arith.constant 0.000000e+00 : f32
    %58 = vector.broadcast %cst_8 : f32 to vector<2x16xf32>
    %cst_9 = arith.constant 0.000000e+00 : f32
    %59 = vector.broadcast %cst_9 : f32 to vector<1x16xf32>
    %cst_10 = arith.constant 0.000000e+00 : f32
    %60 = vector.broadcast %cst_10 : f32 to vector<2x1xf32>
    %cst_11 = arith.constant 0.000000e+00 : f32
    %61 = vector.broadcast %cst_11 : f32 to vector<1x1xf32>
    %cst_12 = arith.constant 0.000000e+00 : f32
    %62 = vector.broadcast %cst_12 : f32 to vector<2x128xf32>
    %c0_i32 = arith.constant 0 : i32
    %63 = vector.broadcast %c0_i32 : i32 to vector<2x128xi32>
    %64 = tpu.iota {dimensions = array<i32: 1>} : vector<2x8xi32>
    %65 = tpu.iota {dimensions = array<i32: 1>} : vector<2x16xi32>
    %66 = tpu.iota {dimensions = array<i32: 1>} : vector<2x128xi32>
    %cst_13 = arith.constant 5.000000e-01 : f32
    %67 = vector.broadcast %cst_13 : f32 to vector<2x8xf32>
    %68 = arith.cmpf ogt, %57, %67 : vector<2x8xf32>
    %cst_14 = arith.constant -1.000000e+09 : f32
    %69 = vector.broadcast %cst_14 : f32 to vector<2x8xf32>
    %70 = arith.select %68, %69, %51 : vector<2x8xi1>, vector<2x8xf32>
    %cst_15 = arith.constant dense<0xFF800000> : vector<2xf32>
    %71 = vector.multi_reduction <maximumf>, %70, %cst_15 [1] : vector<2x8xf32> to vector<2xf32>
    %72 = vector.shape_cast %71 : vector<2xf32> to vector<2x1xf32>
    %73 = vector.broadcast %72 : vector<2x1xf32> to vector<2x8xf32>
    %74 = arith.cmpf oge, %70, %73 : vector<2x8xf32>
    %c8_i32 = arith.constant 8 : i32
    %75 = vector.broadcast %c8_i32 : i32 to vector<2x8xi32>
    %76 = arith.select %74, %64, %75 : vector<2x8xi1>, vector<2x8xi32>
    %cst_16 = arith.constant dense<2147483647> : vector<2xi32>
    %77 = vector.multi_reduction <minsi>, %76, %cst_16 [1] : vector<2x8xi32> to vector<2xi32>
    %78 = vector.shape_cast %77 : vector<2xi32> to vector<2x1xi32>
    %79 = vector.broadcast %78 : vector<2x1xi32> to vector<2x8xi32>
    %80 = arith.cmpi eq, %64, %79 : vector<2x8xi32>
    %81 = arith.extui %80 : vector<2x8xi1> to vector<2x8xi32>
    %82 = arith.sitofp %81 : vector<2x8xi32> to vector<2x8xf32>
    %83 = vector.broadcast %72 : vector<2x1xf32> to vector<2x8xf32>
    %84 = arith.subf %70, %83 : vector<2x8xf32>
    %85 = math.exp %84 : vector<2x8xf32>
    %cst_17 = arith.constant dense<0.000000e+00> : vector<2xf32>
    %86 = vector.multi_reduction <add>, %85, %cst_17 [1] : vector<2x8xf32> to vector<2xf32>
    %87 = vector.shape_cast %86 : vector<2xf32> to vector<2x1xf32>
    %88 = tpu.reciprocal %87 {approx = true} : vector<2x1xf32> -> vector<2x1xf32>
    %cst_18 = arith.constant 1.000000e+00 : f32
    %89 = vector.broadcast %cst_18 : f32 to vector<2x1xf32>
    %90 = arith.minimumf %88, %89 : vector<2x1xf32>
    %91 = arith.mulf %82, %56 : vector<2x8xf32>
    %cst_19 = arith.constant dense<0.000000e+00> : vector<2xf32>
    %92 = vector.multi_reduction <add>, %91, %cst_19 [1] : vector<2x8xf32> to vector<2xf32>
    %93 = vector.shape_cast %92 : vector<2xf32> to vector<2x1xf32>
    %94 = vector.broadcast %93 : vector<2x1xf32> to vector<2x16xf32>
    %95 = arith.mulf %94, %8 : vector<2x16xf32>
    %96 = arith.addf %58, %95 : vector<2x16xf32>
    %97 = arith.subf %11, %96 : vector<2x16xf32>
    %cst_20 = arith.constant dense<0xFF800000> : vector<2xf32>
    %98 = vector.multi_reduction <maximumf>, %97, %cst_20 [1] : vector<2x16xf32> to vector<2xf32>
    %99 = vector.shape_cast %98 : vector<2xf32> to vector<2x1xf32>
    %100 = vector.broadcast %99 : vector<2x1xf32> to vector<2x16xf32>
    %101 = arith.cmpf oge, %97, %100 : vector<2x16xf32>
    %c16_i32 = arith.constant 16 : i32
    %102 = vector.broadcast %c16_i32 : i32 to vector<2x16xi32>
    %103 = arith.select %101, %65, %102 : vector<2x16xi1>, vector<2x16xi32>
    %cst_21 = arith.constant dense<2147483647> : vector<2xi32>
    %104 = vector.multi_reduction <minsi>, %103, %cst_21 [1] : vector<2x16xi32> to vector<2xi32>
    %105 = vector.shape_cast %104 : vector<2xi32> to vector<2x1xi32>
    %106 = vector.broadcast %105 : vector<2x1xi32> to vector<2x16xi32>
    %107 = arith.cmpi eq, %65, %106 : vector<2x16xi32>
    %108 = arith.extui %107 : vector<2x16xi1> to vector<2x16xi32>
    %109 = arith.sitofp %108 : vector<2x16xi32> to vector<2x16xf32>
    %110 = vector.broadcast %99 : vector<2x1xf32> to vector<2x16xf32>
    %111 = arith.subf %97, %110 : vector<2x16xf32>
    %112 = math.exp %111 : vector<2x16xf32>
    %cst_22 = arith.constant dense<0.000000e+00> : vector<2xf32>
    %113 = vector.multi_reduction <add>, %112, %cst_22 [1] : vector<2x16xf32> to vector<2xf32>
    %114 = vector.shape_cast %113 : vector<2xf32> to vector<2x1xf32>
    %115 = tpu.reciprocal %114 {approx = true} : vector<2x1xf32> -> vector<2x1xf32>
    %cst_23 = arith.constant 1.000000e+00 : f32
    %116 = vector.broadcast %cst_23 : f32 to vector<2x1xf32>
    %117 = arith.minimumf %115, %116 : vector<2x1xf32>
    %118 = arith.mulf %109, %8 : vector<2x16xf32>
    %cst_24 = arith.constant dense<0.000000e+00> : vector<2xf32>
    %119 = vector.multi_reduction <add>, %118, %cst_24 [1] : vector<2x16xf32> to vector<2xf32>
    %120 = vector.shape_cast %119 : vector<2xf32> to vector<2x1xf32>
    %121 = arith.mulf %93, %120 : vector<2x1xf32>
    %122 = arith.addf %57, %82 : vector<2x8xf32>
    %123 = vector.broadcast %121 : vector<2x1xf32> to vector<2x16xf32>
    %124 = arith.mulf %109, %123 : vector<2x16xf32>
    %125 = arith.addf %58, %124 : vector<2x16xf32>
    %cst_25 = arith.constant dense<0.000000e+00> : vector<16xf32>
    %126 = vector.multi_reduction <add>, %109, %cst_25 [0] : vector<2x16xf32> to vector<16xf32>
    %127 = vector.shape_cast %126 : vector<16xf32> to vector<1x16xf32>
    %128 = arith.addf %59, %127 : vector<1x16xf32>
    %129 = arith.subf %60, %121 : vector<2x1xf32>
    %130 = arith.mulf %109, %14 : vector<2x16xf32>
    %cst_26 = arith.constant dense<0.000000e+00> : vector<2xf32>
    %131 = vector.multi_reduction <add>, %130, %cst_26 [1] : vector<2x16xf32> to vector<2xf32>
    %132 = vector.shape_cast %131 : vector<2xf32> to vector<2x1xf32>
    %133 = arith.mulf %121, %132 : vector<2x1xf32>
    %cst_27 = arith.constant dense<0.000000e+00> : vector<1xf32>
    %134 = vector.multi_reduction <add>, %133, %cst_27 [0] : vector<2x1xf32> to vector<1xf32>
    %135 = vector.shape_cast %134 : vector<1xf32> to vector<1x1xf32>
    %136 = arith.addf %61, %135 : vector<1x1xf32>
    %c0_i32_28 = arith.constant 0 : i32
    %137 = vector.broadcast %c0_i32_28 : i32 to vector<2x128xi32>
    %138 = arith.cmpi eq, %66, %137 : vector<2x128xi32>
    %c8_i32_29 = arith.constant 8 : i32
    %139 = vector.broadcast %c8_i32_29 : i32 to vector<2x128xi32>
    %140 = arith.cmpi eq, %66, %139 : vector<2x128xi32>
    %cst_30 = arith.constant 0.000000e+00 : f32
    %141 = vector.shape_cast %117 : vector<2x1xf32> to vector<2x1xf32>
    %142 = vector.broadcast %141 : vector<2x1xf32> to vector<2x128xf32>
    %143 = vector.broadcast %cst_30 : f32 to vector<2x128xf32>
    %144 = arith.select %140, %142, %143 : vector<2x128xi1>, vector<2x128xf32>
    %145 = vector.shape_cast %90 : vector<2x1xf32> to vector<2x1xf32>
    %146 = vector.broadcast %145 : vector<2x1xf32> to vector<2x128xf32>
    %147 = arith.select %138, %146, %144 : vector<2x128xi1>, vector<2x128xf32>
    %148 = arith.addf %62, %147 : vector<2x128xf32>
    %c0_i32_31 = arith.constant 0 : i32
    %149 = vector.broadcast %c0_i32_31 : i32 to vector<2x128xi32>
    %150 = arith.cmpi eq, %66, %149 : vector<2x128xi32>
    %151 = vector.shape_cast %78 : vector<2x1xi32> to vector<2x1xi32>
    %152 = vector.broadcast %151 : vector<2x1xi32> to vector<2x128xi32>
    %153 = arith.select %150, %152, %63 : vector<2x128xi1>, vector<2x128xi32>
    %c8_i32_32 = arith.constant 8 : i32
    %154 = vector.broadcast %c8_i32_32 : i32 to vector<2x128xi32>
    %155 = arith.cmpi eq, %66, %154 : vector<2x128xi32>
    %156 = vector.shape_cast %105 : vector<2x1xi32> to vector<2x1xi32>
    %157 = vector.broadcast %156 : vector<2x1xi32> to vector<2x128xi32>
    %158 = arith.select %155, %157, %153 : vector<2x128xi1>, vector<2x128xi32>
    %cst_33 = arith.constant 5.000000e-01 : f32
    %159 = vector.broadcast %cst_33 : f32 to vector<2x8xf32>
    %160 = arith.cmpf ogt, %122, %159 : vector<2x8xf32>
    %cst_34 = arith.constant -1.000000e+09 : f32
    %161 = vector.broadcast %cst_34 : f32 to vector<2x8xf32>
    %162 = arith.select %160, %161, %51 : vector<2x8xi1>, vector<2x8xf32>
    %cst_35 = arith.constant dense<0xFF800000> : vector<2xf32>
    %163 = vector.multi_reduction <maximumf>, %162, %cst_35 [1] : vector<2x8xf32> to vector<2xf32>
    %164 = vector.shape_cast %163 : vector<2xf32> to vector<2x1xf32>
    %165 = vector.broadcast %164 : vector<2x1xf32> to vector<2x8xf32>
    %166 = arith.cmpf oge, %162, %165 : vector<2x8xf32>
    %c8_i32_36 = arith.constant 8 : i32
    %167 = vector.broadcast %c8_i32_36 : i32 to vector<2x8xi32>
    %168 = arith.select %166, %64, %167 : vector<2x8xi1>, vector<2x8xi32>
    %cst_37 = arith.constant dense<2147483647> : vector<2xi32>
    %169 = vector.multi_reduction <minsi>, %168, %cst_37 [1] : vector<2x8xi32> to vector<2xi32>
    %170 = vector.shape_cast %169 : vector<2xi32> to vector<2x1xi32>
    %171 = vector.broadcast %170 : vector<2x1xi32> to vector<2x8xi32>
    %172 = arith.cmpi eq, %64, %171 : vector<2x8xi32>
    %173 = arith.extui %172 : vector<2x8xi1> to vector<2x8xi32>
    %174 = arith.sitofp %173 : vector<2x8xi32> to vector<2x8xf32>
    %175 = vector.broadcast %164 : vector<2x1xf32> to vector<2x8xf32>
    %176 = arith.subf %162, %175 : vector<2x8xf32>
    %177 = math.exp %176 : vector<2x8xf32>
    %cst_38 = arith.constant dense<0.000000e+00> : vector<2xf32>
    %178 = vector.multi_reduction <add>, %177, %cst_38 [1] : vector<2x8xf32> to vector<2xf32>
    %179 = vector.shape_cast %178 : vector<2xf32> to vector<2x1xf32>
    %180 = tpu.reciprocal %179 {approx = true} : vector<2x1xf32> -> vector<2x1xf32>
    %cst_39 = arith.constant 1.000000e+00 : f32
    %181 = vector.broadcast %cst_39 : f32 to vector<2x1xf32>
    %182 = arith.minimumf %180, %181 : vector<2x1xf32>
    %183 = arith.mulf %174, %56 : vector<2x8xf32>
    %cst_40 = arith.constant dense<0.000000e+00> : vector<2xf32>
    %184 = vector.multi_reduction <add>, %183, %cst_40 [1] : vector<2x8xf32> to vector<2xf32>
    %185 = vector.shape_cast %184 : vector<2xf32> to vector<2x1xf32>
    %186 = vector.broadcast %185 : vector<2x1xf32> to vector<2x16xf32>
    %187 = arith.mulf %186, %8 : vector<2x16xf32>
    %188 = arith.addf %125, %187 : vector<2x16xf32>
    %189 = arith.subf %11, %188 : vector<2x16xf32>
    %cst_41 = arith.constant dense<0xFF800000> : vector<2xf32>
    %190 = vector.multi_reduction <maximumf>, %189, %cst_41 [1] : vector<2x16xf32> to vector<2xf32>
    %191 = vector.shape_cast %190 : vector<2xf32> to vector<2x1xf32>
    %192 = vector.broadcast %191 : vector<2x1xf32> to vector<2x16xf32>
    %193 = arith.cmpf oge, %189, %192 : vector<2x16xf32>
    %c16_i32_42 = arith.constant 16 : i32
    %194 = vector.broadcast %c16_i32_42 : i32 to vector<2x16xi32>
    %195 = arith.select %193, %65, %194 : vector<2x16xi1>, vector<2x16xi32>
    %cst_43 = arith.constant dense<2147483647> : vector<2xi32>
    %196 = vector.multi_reduction <minsi>, %195, %cst_43 [1] : vector<2x16xi32> to vector<2xi32>
    %197 = vector.shape_cast %196 : vector<2xi32> to vector<2x1xi32>
    %198 = vector.broadcast %197 : vector<2x1xi32> to vector<2x16xi32>
    %199 = arith.cmpi eq, %65, %198 : vector<2x16xi32>
    %200 = arith.extui %199 : vector<2x16xi1> to vector<2x16xi32>
    %201 = arith.sitofp %200 : vector<2x16xi32> to vector<2x16xf32>
    %202 = vector.broadcast %191 : vector<2x1xf32> to vector<2x16xf32>
    %203 = arith.subf %189, %202 : vector<2x16xf32>
    %204 = math.exp %203 : vector<2x16xf32>
    %cst_44 = arith.constant dense<0.000000e+00> : vector<2xf32>
    %205 = vector.multi_reduction <add>, %204, %cst_44 [1] : vector<2x16xf32> to vector<2xf32>
    %206 = vector.shape_cast %205 : vector<2xf32> to vector<2x1xf32>
    %207 = tpu.reciprocal %206 {approx = true} : vector<2x1xf32> -> vector<2x1xf32>
    %cst_45 = arith.constant 1.000000e+00 : f32
    %208 = vector.broadcast %cst_45 : f32 to vector<2x1xf32>
    %209 = arith.minimumf %207, %208 : vector<2x1xf32>
    %210 = arith.mulf %201, %8 : vector<2x16xf32>
    %cst_46 = arith.constant dense<0.000000e+00> : vector<2xf32>
    %211 = vector.multi_reduction <add>, %210, %cst_46 [1] : vector<2x16xf32> to vector<2xf32>
    %212 = vector.shape_cast %211 : vector<2xf32> to vector<2x1xf32>
    %213 = arith.mulf %185, %212 : vector<2x1xf32>
    %214 = arith.addf %122, %174 : vector<2x8xf32>
    %215 = vector.broadcast %213 : vector<2x1xf32> to vector<2x16xf32>
    %216 = arith.mulf %201, %215 : vector<2x16xf32>
    %217 = arith.addf %125, %216 : vector<2x16xf32>
    %cst_47 = arith.constant dense<0.000000e+00> : vector<16xf32>
    %218 = vector.multi_reduction <add>, %201, %cst_47 [0] : vector<2x16xf32> to vector<16xf32>
    %219 = vector.shape_cast %218 : vector<16xf32> to vector<1x16xf32>
    %220 = arith.addf %128, %219 : vector<1x16xf32>
    %221 = arith.subf %129, %213 : vector<2x1xf32>
    %222 = arith.mulf %201, %14 : vector<2x16xf32>
    %cst_48 = arith.constant dense<0.000000e+00> : vector<2xf32>
    %223 = vector.multi_reduction <add>, %222, %cst_48 [1] : vector<2x16xf32> to vector<2xf32>
    %224 = vector.shape_cast %223 : vector<2xf32> to vector<2x1xf32>
    %225 = arith.mulf %213, %224 : vector<2x1xf32>
    %cst_49 = arith.constant dense<0.000000e+00> : vector<1xf32>
    %226 = vector.multi_reduction <add>, %225, %cst_49 [0] : vector<2x1xf32> to vector<1xf32>
    %227 = vector.shape_cast %226 : vector<1xf32> to vector<1x1xf32>
    %228 = arith.addf %136, %227 : vector<1x1xf32>
    %c1_i32 = arith.constant 1 : i32
    %229 = vector.broadcast %c1_i32 : i32 to vector<2x128xi32>
    %230 = arith.cmpi eq, %66, %229 : vector<2x128xi32>
    %c9_i32 = arith.constant 9 : i32
    %231 = vector.broadcast %c9_i32 : i32 to vector<2x128xi32>
    %232 = arith.cmpi eq, %66, %231 : vector<2x128xi32>
    %cst_50 = arith.constant 0.000000e+00 : f32
    %233 = vector.shape_cast %209 : vector<2x1xf32> to vector<2x1xf32>
    %234 = vector.broadcast %233 : vector<2x1xf32> to vector<2x128xf32>
    %235 = vector.broadcast %cst_50 : f32 to vector<2x128xf32>
    %236 = arith.select %232, %234, %235 : vector<2x128xi1>, vector<2x128xf32>
    %237 = vector.shape_cast %182 : vector<2x1xf32> to vector<2x1xf32>
    %238 = vector.broadcast %237 : vector<2x1xf32> to vector<2x128xf32>
    %239 = arith.select %230, %238, %236 : vector<2x128xi1>, vector<2x128xf32>
    %240 = arith.addf %148, %239 : vector<2x128xf32>
    %c1_i32_51 = arith.constant 1 : i32
    %241 = vector.broadcast %c1_i32_51 : i32 to vector<2x128xi32>
    %242 = arith.cmpi eq, %66, %241 : vector<2x128xi32>
    %243 = vector.shape_cast %170 : vector<2x1xi32> to vector<2x1xi32>
    %244 = vector.broadcast %243 : vector<2x1xi32> to vector<2x128xi32>
    %245 = arith.select %242, %244, %158 : vector<2x128xi1>, vector<2x128xi32>
    %c9_i32_52 = arith.constant 9 : i32
    %246 = vector.broadcast %c9_i32_52 : i32 to vector<2x128xi32>
    %247 = arith.cmpi eq, %66, %246 : vector<2x128xi32>
    %248 = vector.shape_cast %197 : vector<2x1xi32> to vector<2x1xi32>
    %249 = vector.broadcast %248 : vector<2x1xi32> to vector<2x128xi32>
    %250 = arith.select %247, %249, %245 : vector<2x128xi1>, vector<2x128xi32>
    %cst_53 = arith.constant 5.000000e-01 : f32
    %251 = vector.broadcast %cst_53 : f32 to vector<2x8xf32>
    %252 = arith.cmpf ogt, %214, %251 : vector<2x8xf32>
    %cst_54 = arith.constant -1.000000e+09 : f32
    %253 = vector.broadcast %cst_54 : f32 to vector<2x8xf32>
    %254 = arith.select %252, %253, %51 : vector<2x8xi1>, vector<2x8xf32>
    %cst_55 = arith.constant dense<0xFF800000> : vector<2xf32>
    %255 = vector.multi_reduction <maximumf>, %254, %cst_55 [1] : vector<2x8xf32> to vector<2xf32>
    %256 = vector.shape_cast %255 : vector<2xf32> to vector<2x1xf32>
    %257 = vector.broadcast %256 : vector<2x1xf32> to vector<2x8xf32>
    %258 = arith.cmpf oge, %254, %257 : vector<2x8xf32>
    %c8_i32_56 = arith.constant 8 : i32
    %259 = vector.broadcast %c8_i32_56 : i32 to vector<2x8xi32>
    %260 = arith.select %258, %64, %259 : vector<2x8xi1>, vector<2x8xi32>
    %cst_57 = arith.constant dense<2147483647> : vector<2xi32>
    %261 = vector.multi_reduction <minsi>, %260, %cst_57 [1] : vector<2x8xi32> to vector<2xi32>
    %262 = vector.shape_cast %261 : vector<2xi32> to vector<2x1xi32>
    %263 = vector.broadcast %262 : vector<2x1xi32> to vector<2x8xi32>
    %264 = arith.cmpi eq, %64, %263 : vector<2x8xi32>
    %265 = arith.extui %264 : vector<2x8xi1> to vector<2x8xi32>
    %266 = arith.sitofp %265 : vector<2x8xi32> to vector<2x8xf32>
    %267 = vector.broadcast %256 : vector<2x1xf32> to vector<2x8xf32>
    %268 = arith.subf %254, %267 : vector<2x8xf32>
    %269 = math.exp %268 : vector<2x8xf32>
    %cst_58 = arith.constant dense<0.000000e+00> : vector<2xf32>
    %270 = vector.multi_reduction <add>, %269, %cst_58 [1] : vector<2x8xf32> to vector<2xf32>
    %271 = vector.shape_cast %270 : vector<2xf32> to vector<2x1xf32>
    %272 = tpu.reciprocal %271 {approx = true} : vector<2x1xf32> -> vector<2x1xf32>
    %cst_59 = arith.constant 1.000000e+00 : f32
    %273 = vector.broadcast %cst_59 : f32 to vector<2x1xf32>
    %274 = arith.minimumf %272, %273 : vector<2x1xf32>
    %275 = arith.mulf %266, %56 : vector<2x8xf32>
    %cst_60 = arith.constant dense<0.000000e+00> : vector<2xf32>
    %276 = vector.multi_reduction <add>, %275, %cst_60 [1] : vector<2x8xf32> to vector<2xf32>
    %277 = vector.shape_cast %276 : vector<2xf32> to vector<2x1xf32>
    %278 = vector.broadcast %277 : vector<2x1xf32> to vector<2x16xf32>
    %279 = arith.mulf %278, %8 : vector<2x16xf32>
    %280 = arith.addf %217, %279 : vector<2x16xf32>
    %281 = arith.subf %11, %280 : vector<2x16xf32>
    %cst_61 = arith.constant dense<0xFF800000> : vector<2xf32>
    %282 = vector.multi_reduction <maximumf>, %281, %cst_61 [1] : vector<2x16xf32> to vector<2xf32>
    %283 = vector.shape_cast %282 : vector<2xf32> to vector<2x1xf32>
    %284 = vector.broadcast %283 : vector<2x1xf32> to vector<2x16xf32>
    %285 = arith.cmpf oge, %281, %284 : vector<2x16xf32>
    %c16_i32_62 = arith.constant 16 : i32
    %286 = vector.broadcast %c16_i32_62 : i32 to vector<2x16xi32>
    %287 = arith.select %285, %65, %286 : vector<2x16xi1>, vector<2x16xi32>
    %cst_63 = arith.constant dense<2147483647> : vector<2xi32>
    %288 = vector.multi_reduction <minsi>, %287, %cst_63 [1] : vector<2x16xi32> to vector<2xi32>
    %289 = vector.shape_cast %288 : vector<2xi32> to vector<2x1xi32>
    %290 = vector.broadcast %289 : vector<2x1xi32> to vector<2x16xi32>
    %291 = arith.cmpi eq, %65, %290 : vector<2x16xi32>
    %292 = arith.extui %291 : vector<2x16xi1> to vector<2x16xi32>
    %293 = arith.sitofp %292 : vector<2x16xi32> to vector<2x16xf32>
    %294 = vector.broadcast %283 : vector<2x1xf32> to vector<2x16xf32>
    %295 = arith.subf %281, %294 : vector<2x16xf32>
    %296 = math.exp %295 : vector<2x16xf32>
    %cst_64 = arith.constant dense<0.000000e+00> : vector<2xf32>
    %297 = vector.multi_reduction <add>, %296, %cst_64 [1] : vector<2x16xf32> to vector<2xf32>
    %298 = vector.shape_cast %297 : vector<2xf32> to vector<2x1xf32>
    %299 = tpu.reciprocal %298 {approx = true} : vector<2x1xf32> -> vector<2x1xf32>
    %cst_65 = arith.constant 1.000000e+00 : f32
    %300 = vector.broadcast %cst_65 : f32 to vector<2x1xf32>
    %301 = arith.minimumf %299, %300 : vector<2x1xf32>
    %302 = arith.mulf %293, %8 : vector<2x16xf32>
    %cst_66 = arith.constant dense<0.000000e+00> : vector<2xf32>
    %303 = vector.multi_reduction <add>, %302, %cst_66 [1] : vector<2x16xf32> to vector<2xf32>
    %304 = vector.shape_cast %303 : vector<2xf32> to vector<2x1xf32>
    %305 = arith.mulf %277, %304 : vector<2x1xf32>
    %306 = arith.addf %214, %266 : vector<2x8xf32>
    %307 = vector.broadcast %305 : vector<2x1xf32> to vector<2x16xf32>
    %308 = arith.mulf %293, %307 : vector<2x16xf32>
    %309 = arith.addf %217, %308 : vector<2x16xf32>
    %cst_67 = arith.constant dense<0.000000e+00> : vector<16xf32>
    %310 = vector.multi_reduction <add>, %293, %cst_67 [0] : vector<2x16xf32> to vector<16xf32>
    %311 = vector.shape_cast %310 : vector<16xf32> to vector<1x16xf32>
    %312 = arith.addf %220, %311 : vector<1x16xf32>
    %313 = arith.subf %221, %305 : vector<2x1xf32>
    %314 = arith.mulf %293, %14 : vector<2x16xf32>
    %cst_68 = arith.constant dense<0.000000e+00> : vector<2xf32>
    %315 = vector.multi_reduction <add>, %314, %cst_68 [1] : vector<2x16xf32> to vector<2xf32>
    %316 = vector.shape_cast %315 : vector<2xf32> to vector<2x1xf32>
    %317 = arith.mulf %305, %316 : vector<2x1xf32>
    %cst_69 = arith.constant dense<0.000000e+00> : vector<1xf32>
    %318 = vector.multi_reduction <add>, %317, %cst_69 [0] : vector<2x1xf32> to vector<1xf32>
    %319 = vector.shape_cast %318 : vector<1xf32> to vector<1x1xf32>
    %320 = arith.addf %228, %319 : vector<1x1xf32>
    %c2_i32 = arith.constant 2 : i32
    %321 = vector.broadcast %c2_i32 : i32 to vector<2x128xi32>
    %322 = arith.cmpi eq, %66, %321 : vector<2x128xi32>
    %c10_i32 = arith.constant 10 : i32
    %323 = vector.broadcast %c10_i32 : i32 to vector<2x128xi32>
    %324 = arith.cmpi eq, %66, %323 : vector<2x128xi32>
    %cst_70 = arith.constant 0.000000e+00 : f32
    %325 = vector.shape_cast %301 : vector<2x1xf32> to vector<2x1xf32>
    %326 = vector.broadcast %325 : vector<2x1xf32> to vector<2x128xf32>
    %327 = vector.broadcast %cst_70 : f32 to vector<2x128xf32>
    %328 = arith.select %324, %326, %327 : vector<2x128xi1>, vector<2x128xf32>
    %329 = vector.shape_cast %274 : vector<2x1xf32> to vector<2x1xf32>
    %330 = vector.broadcast %329 : vector<2x1xf32> to vector<2x128xf32>
    %331 = arith.select %322, %330, %328 : vector<2x128xi1>, vector<2x128xf32>
    %332 = arith.addf %240, %331 : vector<2x128xf32>
    %c2_i32_71 = arith.constant 2 : i32
    %333 = vector.broadcast %c2_i32_71 : i32 to vector<2x128xi32>
    %334 = arith.cmpi eq, %66, %333 : vector<2x128xi32>
    %335 = vector.shape_cast %262 : vector<2x1xi32> to vector<2x1xi32>
    %336 = vector.broadcast %335 : vector<2x1xi32> to vector<2x128xi32>
    %337 = arith.select %334, %336, %250 : vector<2x128xi1>, vector<2x128xi32>
    %c10_i32_72 = arith.constant 10 : i32
    %338 = vector.broadcast %c10_i32_72 : i32 to vector<2x128xi32>
    %339 = arith.cmpi eq, %66, %338 : vector<2x128xi32>
    %340 = vector.shape_cast %289 : vector<2x1xi32> to vector<2x1xi32>
    %341 = vector.broadcast %340 : vector<2x1xi32> to vector<2x128xi32>
    %342 = arith.select %339, %341, %337 : vector<2x128xi1>, vector<2x128xi32>
    %cst_73 = arith.constant 5.000000e-01 : f32
    %343 = vector.broadcast %cst_73 : f32 to vector<2x8xf32>
    %344 = arith.cmpf ogt, %306, %343 : vector<2x8xf32>
    %cst_74 = arith.constant -1.000000e+09 : f32
    %345 = vector.broadcast %cst_74 : f32 to vector<2x8xf32>
    %346 = arith.select %344, %345, %51 : vector<2x8xi1>, vector<2x8xf32>
    %cst_75 = arith.constant dense<0xFF800000> : vector<2xf32>
    %347 = vector.multi_reduction <maximumf>, %346, %cst_75 [1] : vector<2x8xf32> to vector<2xf32>
    %348 = vector.shape_cast %347 : vector<2xf32> to vector<2x1xf32>
    %349 = vector.broadcast %348 : vector<2x1xf32> to vector<2x8xf32>
    %350 = arith.cmpf oge, %346, %349 : vector<2x8xf32>
    %c8_i32_76 = arith.constant 8 : i32
    %351 = vector.broadcast %c8_i32_76 : i32 to vector<2x8xi32>
    %352 = arith.select %350, %64, %351 : vector<2x8xi1>, vector<2x8xi32>
    %cst_77 = arith.constant dense<2147483647> : vector<2xi32>
    %353 = vector.multi_reduction <minsi>, %352, %cst_77 [1] : vector<2x8xi32> to vector<2xi32>
    %354 = vector.shape_cast %353 : vector<2xi32> to vector<2x1xi32>
    %355 = vector.broadcast %354 : vector<2x1xi32> to vector<2x8xi32>
    %356 = arith.cmpi eq, %64, %355 : vector<2x8xi32>
    %357 = arith.extui %356 : vector<2x8xi1> to vector<2x8xi32>
    %358 = arith.sitofp %357 : vector<2x8xi32> to vector<2x8xf32>
    %359 = vector.broadcast %348 : vector<2x1xf32> to vector<2x8xf32>
    %360 = arith.subf %346, %359 : vector<2x8xf32>
    %361 = math.exp %360 : vector<2x8xf32>
    %cst_78 = arith.constant dense<0.000000e+00> : vector<2xf32>
    %362 = vector.multi_reduction <add>, %361, %cst_78 [1] : vector<2x8xf32> to vector<2xf32>
    %363 = vector.shape_cast %362 : vector<2xf32> to vector<2x1xf32>
    %364 = tpu.reciprocal %363 {approx = true} : vector<2x1xf32> -> vector<2x1xf32>
    %cst_79 = arith.constant 1.000000e+00 : f32
    %365 = vector.broadcast %cst_79 : f32 to vector<2x1xf32>
    %366 = arith.minimumf %364, %365 : vector<2x1xf32>
    %367 = arith.mulf %358, %56 : vector<2x8xf32>
    %cst_80 = arith.constant dense<0.000000e+00> : vector<2xf32>
    %368 = vector.multi_reduction <add>, %367, %cst_80 [1] : vector<2x8xf32> to vector<2xf32>
    %369 = vector.shape_cast %368 : vector<2xf32> to vector<2x1xf32>
    %370 = vector.broadcast %369 : vector<2x1xf32> to vector<2x16xf32>
    %371 = arith.mulf %370, %8 : vector<2x16xf32>
    %372 = arith.addf %309, %371 : vector<2x16xf32>
    %373 = arith.subf %11, %372 : vector<2x16xf32>
    %cst_81 = arith.constant dense<0xFF800000> : vector<2xf32>
    %374 = vector.multi_reduction <maximumf>, %373, %cst_81 [1] : vector<2x16xf32> to vector<2xf32>
    %375 = vector.shape_cast %374 : vector<2xf32> to vector<2x1xf32>
    %376 = vector.broadcast %375 : vector<2x1xf32> to vector<2x16xf32>
    %377 = arith.cmpf oge, %373, %376 : vector<2x16xf32>
    %c16_i32_82 = arith.constant 16 : i32
    %378 = vector.broadcast %c16_i32_82 : i32 to vector<2x16xi32>
    %379 = arith.select %377, %65, %378 : vector<2x16xi1>, vector<2x16xi32>
    %cst_83 = arith.constant dense<2147483647> : vector<2xi32>
    %380 = vector.multi_reduction <minsi>, %379, %cst_83 [1] : vector<2x16xi32> to vector<2xi32>
    %381 = vector.shape_cast %380 : vector<2xi32> to vector<2x1xi32>
    %382 = vector.broadcast %381 : vector<2x1xi32> to vector<2x16xi32>
    %383 = arith.cmpi eq, %65, %382 : vector<2x16xi32>
    %384 = arith.extui %383 : vector<2x16xi1> to vector<2x16xi32>
    %385 = arith.sitofp %384 : vector<2x16xi32> to vector<2x16xf32>
    %386 = vector.broadcast %375 : vector<2x1xf32> to vector<2x16xf32>
    %387 = arith.subf %373, %386 : vector<2x16xf32>
    %388 = math.exp %387 : vector<2x16xf32>
    %cst_84 = arith.constant dense<0.000000e+00> : vector<2xf32>
    %389 = vector.multi_reduction <add>, %388, %cst_84 [1] : vector<2x16xf32> to vector<2xf32>
    %390 = vector.shape_cast %389 : vector<2xf32> to vector<2x1xf32>
    %391 = tpu.reciprocal %390 {approx = true} : vector<2x1xf32> -> vector<2x1xf32>
    %cst_85 = arith.constant 1.000000e+00 : f32
    %392 = vector.broadcast %cst_85 : f32 to vector<2x1xf32>
    %393 = arith.minimumf %391, %392 : vector<2x1xf32>
    %394 = arith.mulf %385, %8 : vector<2x16xf32>
    %cst_86 = arith.constant dense<0.000000e+00> : vector<2xf32>
    %395 = vector.multi_reduction <add>, %394, %cst_86 [1] : vector<2x16xf32> to vector<2xf32>
    %396 = vector.shape_cast %395 : vector<2xf32> to vector<2x1xf32>
    %397 = arith.mulf %369, %396 : vector<2x1xf32>
    %398 = arith.addf %306, %358 : vector<2x8xf32>
    %399 = vector.broadcast %397 : vector<2x1xf32> to vector<2x16xf32>
    %400 = arith.mulf %385, %399 : vector<2x16xf32>
    %401 = arith.addf %309, %400 : vector<2x16xf32>
    %cst_87 = arith.constant dense<0.000000e+00> : vector<16xf32>
    %402 = vector.multi_reduction <add>, %385, %cst_87 [0] : vector<2x16xf32> to vector<16xf32>
    %403 = vector.shape_cast %402 : vector<16xf32> to vector<1x16xf32>
    %404 = arith.addf %312, %403 : vector<1x16xf32>
    %405 = arith.subf %313, %397 : vector<2x1xf32>
    %406 = arith.mulf %385, %14 : vector<2x16xf32>
    %cst_88 = arith.constant dense<0.000000e+00> : vector<2xf32>
    %407 = vector.multi_reduction <add>, %406, %cst_88 [1] : vector<2x16xf32> to vector<2xf32>
    %408 = vector.shape_cast %407 : vector<2xf32> to vector<2x1xf32>
    %409 = arith.mulf %397, %408 : vector<2x1xf32>
    %cst_89 = arith.constant dense<0.000000e+00> : vector<1xf32>
    %410 = vector.multi_reduction <add>, %409, %cst_89 [0] : vector<2x1xf32> to vector<1xf32>
    %411 = vector.shape_cast %410 : vector<1xf32> to vector<1x1xf32>
    %412 = arith.addf %320, %411 : vector<1x1xf32>
    %c3_i32 = arith.constant 3 : i32
    %413 = vector.broadcast %c3_i32 : i32 to vector<2x128xi32>
    %414 = arith.cmpi eq, %66, %413 : vector<2x128xi32>
    %c11_i32 = arith.constant 11 : i32
    %415 = vector.broadcast %c11_i32 : i32 to vector<2x128xi32>
    %416 = arith.cmpi eq, %66, %415 : vector<2x128xi32>
    %cst_90 = arith.constant 0.000000e+00 : f32
    %417 = vector.shape_cast %393 : vector<2x1xf32> to vector<2x1xf32>
    %418 = vector.broadcast %417 : vector<2x1xf32> to vector<2x128xf32>
    %419 = vector.broadcast %cst_90 : f32 to vector<2x128xf32>
    %420 = arith.select %416, %418, %419 : vector<2x128xi1>, vector<2x128xf32>
    %421 = vector.shape_cast %366 : vector<2x1xf32> to vector<2x1xf32>
    %422 = vector.broadcast %421 : vector<2x1xf32> to vector<2x128xf32>
    %423 = arith.select %414, %422, %420 : vector<2x128xi1>, vector<2x128xf32>
    %424 = arith.addf %332, %423 : vector<2x128xf32>
    %c3_i32_91 = arith.constant 3 : i32
    %425 = vector.broadcast %c3_i32_91 : i32 to vector<2x128xi32>
    %426 = arith.cmpi eq, %66, %425 : vector<2x128xi32>
    %427 = vector.shape_cast %354 : vector<2x1xi32> to vector<2x1xi32>
    %428 = vector.broadcast %427 : vector<2x1xi32> to vector<2x128xi32>
    %429 = arith.select %426, %428, %342 : vector<2x128xi1>, vector<2x128xi32>
    %c11_i32_92 = arith.constant 11 : i32
    %430 = vector.broadcast %c11_i32_92 : i32 to vector<2x128xi32>
    %431 = arith.cmpi eq, %66, %430 : vector<2x128xi32>
    %432 = vector.shape_cast %381 : vector<2x1xi32> to vector<2x1xi32>
    %433 = vector.broadcast %432 : vector<2x1xi32> to vector<2x128xi32>
    %434 = arith.select %431, %433, %429 : vector<2x128xi1>, vector<2x128xi32>
    %cst_93 = arith.constant 5.000000e-01 : f32
    %435 = vector.broadcast %cst_93 : f32 to vector<2x8xf32>
    %436 = arith.cmpf ogt, %398, %435 : vector<2x8xf32>
    %cst_94 = arith.constant -1.000000e+09 : f32
    %437 = vector.broadcast %cst_94 : f32 to vector<2x8xf32>
    %438 = arith.select %436, %437, %51 : vector<2x8xi1>, vector<2x8xf32>
    %cst_95 = arith.constant dense<0xFF800000> : vector<2xf32>
    %439 = vector.multi_reduction <maximumf>, %438, %cst_95 [1] : vector<2x8xf32> to vector<2xf32>
    %440 = vector.shape_cast %439 : vector<2xf32> to vector<2x1xf32>
    %441 = vector.broadcast %440 : vector<2x1xf32> to vector<2x8xf32>
    %442 = arith.cmpf oge, %438, %441 : vector<2x8xf32>
    %c8_i32_96 = arith.constant 8 : i32
    %443 = vector.broadcast %c8_i32_96 : i32 to vector<2x8xi32>
    %444 = arith.select %442, %64, %443 : vector<2x8xi1>, vector<2x8xi32>
    %cst_97 = arith.constant dense<2147483647> : vector<2xi32>
    %445 = vector.multi_reduction <minsi>, %444, %cst_97 [1] : vector<2x8xi32> to vector<2xi32>
    %446 = vector.shape_cast %445 : vector<2xi32> to vector<2x1xi32>
    %447 = vector.broadcast %446 : vector<2x1xi32> to vector<2x8xi32>
    %448 = arith.cmpi eq, %64, %447 : vector<2x8xi32>
    %449 = arith.extui %448 : vector<2x8xi1> to vector<2x8xi32>
    %450 = arith.sitofp %449 : vector<2x8xi32> to vector<2x8xf32>
    %451 = vector.broadcast %440 : vector<2x1xf32> to vector<2x8xf32>
    %452 = arith.subf %438, %451 : vector<2x8xf32>
    %453 = math.exp %452 : vector<2x8xf32>
    %cst_98 = arith.constant dense<0.000000e+00> : vector<2xf32>
    %454 = vector.multi_reduction <add>, %453, %cst_98 [1] : vector<2x8xf32> to vector<2xf32>
    %455 = vector.shape_cast %454 : vector<2xf32> to vector<2x1xf32>
    %456 = tpu.reciprocal %455 {approx = true} : vector<2x1xf32> -> vector<2x1xf32>
    %cst_99 = arith.constant 1.000000e+00 : f32
    %457 = vector.broadcast %cst_99 : f32 to vector<2x1xf32>
    %458 = arith.minimumf %456, %457 : vector<2x1xf32>
    %459 = arith.mulf %450, %56 : vector<2x8xf32>
    %cst_100 = arith.constant dense<0.000000e+00> : vector<2xf32>
    %460 = vector.multi_reduction <add>, %459, %cst_100 [1] : vector<2x8xf32> to vector<2xf32>
    %461 = vector.shape_cast %460 : vector<2xf32> to vector<2x1xf32>
    %462 = vector.broadcast %461 : vector<2x1xf32> to vector<2x16xf32>
    %463 = arith.mulf %462, %8 : vector<2x16xf32>
    %464 = arith.addf %401, %463 : vector<2x16xf32>
    %465 = arith.subf %11, %464 : vector<2x16xf32>
    %cst_101 = arith.constant dense<0xFF800000> : vector<2xf32>
    %466 = vector.multi_reduction <maximumf>, %465, %cst_101 [1] : vector<2x16xf32> to vector<2xf32>
    %467 = vector.shape_cast %466 : vector<2xf32> to vector<2x1xf32>
    %468 = vector.broadcast %467 : vector<2x1xf32> to vector<2x16xf32>
    %469 = arith.cmpf oge, %465, %468 : vector<2x16xf32>
    %c16_i32_102 = arith.constant 16 : i32
    %470 = vector.broadcast %c16_i32_102 : i32 to vector<2x16xi32>
    %471 = arith.select %469, %65, %470 : vector<2x16xi1>, vector<2x16xi32>
    %cst_103 = arith.constant dense<2147483647> : vector<2xi32>
    %472 = vector.multi_reduction <minsi>, %471, %cst_103 [1] : vector<2x16xi32> to vector<2xi32>
    %473 = vector.shape_cast %472 : vector<2xi32> to vector<2x1xi32>
    %474 = vector.broadcast %473 : vector<2x1xi32> to vector<2x16xi32>
    %475 = arith.cmpi eq, %65, %474 : vector<2x16xi32>
    %476 = arith.extui %475 : vector<2x16xi1> to vector<2x16xi32>
    %477 = arith.sitofp %476 : vector<2x16xi32> to vector<2x16xf32>
    %478 = vector.broadcast %467 : vector<2x1xf32> to vector<2x16xf32>
    %479 = arith.subf %465, %478 : vector<2x16xf32>
    %480 = math.exp %479 : vector<2x16xf32>
    %cst_104 = arith.constant dense<0.000000e+00> : vector<2xf32>
    %481 = vector.multi_reduction <add>, %480, %cst_104 [1] : vector<2x16xf32> to vector<2xf32>
    %482 = vector.shape_cast %481 : vector<2xf32> to vector<2x1xf32>
    %483 = tpu.reciprocal %482 {approx = true} : vector<2x1xf32> -> vector<2x1xf32>
    %cst_105 = arith.constant 1.000000e+00 : f32
    %484 = vector.broadcast %cst_105 : f32 to vector<2x1xf32>
    %485 = arith.minimumf %483, %484 : vector<2x1xf32>
    %486 = arith.mulf %477, %8 : vector<2x16xf32>
    %cst_106 = arith.constant dense<0.000000e+00> : vector<2xf32>
    %487 = vector.multi_reduction <add>, %486, %cst_106 [1] : vector<2x16xf32> to vector<2xf32>
    %488 = vector.shape_cast %487 : vector<2xf32> to vector<2x1xf32>
    %489 = arith.mulf %461, %488 : vector<2x1xf32>
    %490 = arith.addf %398, %450 : vector<2x8xf32>
    %491 = vector.broadcast %489 : vector<2x1xf32> to vector<2x16xf32>
    %492 = arith.mulf %477, %491 : vector<2x16xf32>
    %493 = arith.addf %401, %492 : vector<2x16xf32>
    %cst_107 = arith.constant dense<0.000000e+00> : vector<16xf32>
    %494 = vector.multi_reduction <add>, %477, %cst_107 [0] : vector<2x16xf32> to vector<16xf32>
    %495 = vector.shape_cast %494 : vector<16xf32> to vector<1x16xf32>
    %496 = arith.addf %404, %495 : vector<1x16xf32>
    %497 = arith.subf %405, %489 : vector<2x1xf32>
    %498 = arith.mulf %477, %14 : vector<2x16xf32>
    %cst_108 = arith.constant dense<0.000000e+00> : vector<2xf32>
    %499 = vector.multi_reduction <add>, %498, %cst_108 [1] : vector<2x16xf32> to vector<2xf32>
    %500 = vector.shape_cast %499 : vector<2xf32> to vector<2x1xf32>
    %501 = arith.mulf %489, %500 : vector<2x1xf32>
    %cst_109 = arith.constant dense<0.000000e+00> : vector<1xf32>
    %502 = vector.multi_reduction <add>, %501, %cst_109 [0] : vector<2x1xf32> to vector<1xf32>
    %503 = vector.shape_cast %502 : vector<1xf32> to vector<1x1xf32>
    %504 = arith.addf %412, %503 : vector<1x1xf32>
    %c4_i32 = arith.constant 4 : i32
    %505 = vector.broadcast %c4_i32 : i32 to vector<2x128xi32>
    %506 = arith.cmpi eq, %66, %505 : vector<2x128xi32>
    %c12_i32 = arith.constant 12 : i32
    %507 = vector.broadcast %c12_i32 : i32 to vector<2x128xi32>
    %508 = arith.cmpi eq, %66, %507 : vector<2x128xi32>
    %cst_110 = arith.constant 0.000000e+00 : f32
    %509 = vector.shape_cast %485 : vector<2x1xf32> to vector<2x1xf32>
    %510 = vector.broadcast %509 : vector<2x1xf32> to vector<2x128xf32>
    %511 = vector.broadcast %cst_110 : f32 to vector<2x128xf32>
    %512 = arith.select %508, %510, %511 : vector<2x128xi1>, vector<2x128xf32>
    %513 = vector.shape_cast %458 : vector<2x1xf32> to vector<2x1xf32>
    %514 = vector.broadcast %513 : vector<2x1xf32> to vector<2x128xf32>
    %515 = arith.select %506, %514, %512 : vector<2x128xi1>, vector<2x128xf32>
    %516 = arith.addf %424, %515 : vector<2x128xf32>
    %c4_i32_111 = arith.constant 4 : i32
    %517 = vector.broadcast %c4_i32_111 : i32 to vector<2x128xi32>
    %518 = arith.cmpi eq, %66, %517 : vector<2x128xi32>
    %519 = vector.shape_cast %446 : vector<2x1xi32> to vector<2x1xi32>
    %520 = vector.broadcast %519 : vector<2x1xi32> to vector<2x128xi32>
    %521 = arith.select %518, %520, %434 : vector<2x128xi1>, vector<2x128xi32>
    %c12_i32_112 = arith.constant 12 : i32
    %522 = vector.broadcast %c12_i32_112 : i32 to vector<2x128xi32>
    %523 = arith.cmpi eq, %66, %522 : vector<2x128xi32>
    %524 = vector.shape_cast %473 : vector<2x1xi32> to vector<2x1xi32>
    %525 = vector.broadcast %524 : vector<2x1xi32> to vector<2x128xi32>
    %526 = arith.select %523, %525, %521 : vector<2x128xi1>, vector<2x128xi32>
    %cst_113 = arith.constant 5.000000e-01 : f32
    %527 = vector.broadcast %cst_113 : f32 to vector<2x8xf32>
    %528 = arith.cmpf ogt, %490, %527 : vector<2x8xf32>
    %cst_114 = arith.constant -1.000000e+09 : f32
    %529 = vector.broadcast %cst_114 : f32 to vector<2x8xf32>
    %530 = arith.select %528, %529, %51 : vector<2x8xi1>, vector<2x8xf32>
    %cst_115 = arith.constant dense<0xFF800000> : vector<2xf32>
    %531 = vector.multi_reduction <maximumf>, %530, %cst_115 [1] : vector<2x8xf32> to vector<2xf32>
    %532 = vector.shape_cast %531 : vector<2xf32> to vector<2x1xf32>
    %533 = vector.broadcast %532 : vector<2x1xf32> to vector<2x8xf32>
    %534 = arith.cmpf oge, %530, %533 : vector<2x8xf32>
    %c8_i32_116 = arith.constant 8 : i32
    %535 = vector.broadcast %c8_i32_116 : i32 to vector<2x8xi32>
    %536 = arith.select %534, %64, %535 : vector<2x8xi1>, vector<2x8xi32>
    %cst_117 = arith.constant dense<2147483647> : vector<2xi32>
    %537 = vector.multi_reduction <minsi>, %536, %cst_117 [1] : vector<2x8xi32> to vector<2xi32>
    %538 = vector.shape_cast %537 : vector<2xi32> to vector<2x1xi32>
    %539 = vector.broadcast %538 : vector<2x1xi32> to vector<2x8xi32>
    %540 = arith.cmpi eq, %64, %539 : vector<2x8xi32>
    %541 = arith.extui %540 : vector<2x8xi1> to vector<2x8xi32>
    %542 = arith.sitofp %541 : vector<2x8xi32> to vector<2x8xf32>
    %543 = vector.broadcast %532 : vector<2x1xf32> to vector<2x8xf32>
    %544 = arith.subf %530, %543 : vector<2x8xf32>
    %545 = math.exp %544 : vector<2x8xf32>
    %cst_118 = arith.constant dense<0.000000e+00> : vector<2xf32>
    %546 = vector.multi_reduction <add>, %545, %cst_118 [1] : vector<2x8xf32> to vector<2xf32>
    %547 = vector.shape_cast %546 : vector<2xf32> to vector<2x1xf32>
    %548 = tpu.reciprocal %547 {approx = true} : vector<2x1xf32> -> vector<2x1xf32>
    %cst_119 = arith.constant 1.000000e+00 : f32
    %549 = vector.broadcast %cst_119 : f32 to vector<2x1xf32>
    %550 = arith.minimumf %548, %549 : vector<2x1xf32>
    %551 = arith.mulf %542, %56 : vector<2x8xf32>
    %cst_120 = arith.constant dense<0.000000e+00> : vector<2xf32>
    %552 = vector.multi_reduction <add>, %551, %cst_120 [1] : vector<2x8xf32> to vector<2xf32>
    %553 = vector.shape_cast %552 : vector<2xf32> to vector<2x1xf32>
    %554 = vector.broadcast %553 : vector<2x1xf32> to vector<2x16xf32>
    %555 = arith.mulf %554, %8 : vector<2x16xf32>
    %556 = arith.addf %493, %555 : vector<2x16xf32>
    %557 = arith.subf %11, %556 : vector<2x16xf32>
    %cst_121 = arith.constant dense<0xFF800000> : vector<2xf32>
    %558 = vector.multi_reduction <maximumf>, %557, %cst_121 [1] : vector<2x16xf32> to vector<2xf32>
    %559 = vector.shape_cast %558 : vector<2xf32> to vector<2x1xf32>
    %560 = vector.broadcast %559 : vector<2x1xf32> to vector<2x16xf32>
    %561 = arith.cmpf oge, %557, %560 : vector<2x16xf32>
    %c16_i32_122 = arith.constant 16 : i32
    %562 = vector.broadcast %c16_i32_122 : i32 to vector<2x16xi32>
    %563 = arith.select %561, %65, %562 : vector<2x16xi1>, vector<2x16xi32>
    %cst_123 = arith.constant dense<2147483647> : vector<2xi32>
    %564 = vector.multi_reduction <minsi>, %563, %cst_123 [1] : vector<2x16xi32> to vector<2xi32>
    %565 = vector.shape_cast %564 : vector<2xi32> to vector<2x1xi32>
    %566 = vector.broadcast %565 : vector<2x1xi32> to vector<2x16xi32>
    %567 = arith.cmpi eq, %65, %566 : vector<2x16xi32>
    %568 = arith.extui %567 : vector<2x16xi1> to vector<2x16xi32>
    %569 = arith.sitofp %568 : vector<2x16xi32> to vector<2x16xf32>
    %570 = vector.broadcast %559 : vector<2x1xf32> to vector<2x16xf32>
    %571 = arith.subf %557, %570 : vector<2x16xf32>
    %572 = math.exp %571 : vector<2x16xf32>
    %cst_124 = arith.constant dense<0.000000e+00> : vector<2xf32>
    %573 = vector.multi_reduction <add>, %572, %cst_124 [1] : vector<2x16xf32> to vector<2xf32>
    %574 = vector.shape_cast %573 : vector<2xf32> to vector<2x1xf32>
    %575 = tpu.reciprocal %574 {approx = true} : vector<2x1xf32> -> vector<2x1xf32>
    %cst_125 = arith.constant 1.000000e+00 : f32
    %576 = vector.broadcast %cst_125 : f32 to vector<2x1xf32>
    %577 = arith.minimumf %575, %576 : vector<2x1xf32>
    %578 = arith.mulf %569, %8 : vector<2x16xf32>
    %cst_126 = arith.constant dense<0.000000e+00> : vector<2xf32>
    %579 = vector.multi_reduction <add>, %578, %cst_126 [1] : vector<2x16xf32> to vector<2xf32>
    %580 = vector.shape_cast %579 : vector<2xf32> to vector<2x1xf32>
    %581 = arith.mulf %553, %580 : vector<2x1xf32>
    %582 = arith.addf %490, %542 : vector<2x8xf32>
    %583 = vector.broadcast %581 : vector<2x1xf32> to vector<2x16xf32>
    %584 = arith.mulf %569, %583 : vector<2x16xf32>
    %585 = arith.addf %493, %584 : vector<2x16xf32>
    %cst_127 = arith.constant dense<0.000000e+00> : vector<16xf32>
    %586 = vector.multi_reduction <add>, %569, %cst_127 [0] : vector<2x16xf32> to vector<16xf32>
    %587 = vector.shape_cast %586 : vector<16xf32> to vector<1x16xf32>
    %588 = arith.addf %496, %587 : vector<1x16xf32>
    %589 = arith.subf %497, %581 : vector<2x1xf32>
    %590 = arith.mulf %569, %14 : vector<2x16xf32>
    %cst_128 = arith.constant dense<0.000000e+00> : vector<2xf32>
    %591 = vector.multi_reduction <add>, %590, %cst_128 [1] : vector<2x16xf32> to vector<2xf32>
    %592 = vector.shape_cast %591 : vector<2xf32> to vector<2x1xf32>
    %593 = arith.mulf %581, %592 : vector<2x1xf32>
    %cst_129 = arith.constant dense<0.000000e+00> : vector<1xf32>
    %594 = vector.multi_reduction <add>, %593, %cst_129 [0] : vector<2x1xf32> to vector<1xf32>
    %595 = vector.shape_cast %594 : vector<1xf32> to vector<1x1xf32>
    %596 = arith.addf %504, %595 : vector<1x1xf32>
    %c5_i32 = arith.constant 5 : i32
    %597 = vector.broadcast %c5_i32 : i32 to vector<2x128xi32>
    %598 = arith.cmpi eq, %66, %597 : vector<2x128xi32>
    %c13_i32 = arith.constant 13 : i32
    %599 = vector.broadcast %c13_i32 : i32 to vector<2x128xi32>
    %600 = arith.cmpi eq, %66, %599 : vector<2x128xi32>
    %cst_130 = arith.constant 0.000000e+00 : f32
    %601 = vector.shape_cast %577 : vector<2x1xf32> to vector<2x1xf32>
    %602 = vector.broadcast %601 : vector<2x1xf32> to vector<2x128xf32>
    %603 = vector.broadcast %cst_130 : f32 to vector<2x128xf32>
    %604 = arith.select %600, %602, %603 : vector<2x128xi1>, vector<2x128xf32>
    %605 = vector.shape_cast %550 : vector<2x1xf32> to vector<2x1xf32>
    %606 = vector.broadcast %605 : vector<2x1xf32> to vector<2x128xf32>
    %607 = arith.select %598, %606, %604 : vector<2x128xi1>, vector<2x128xf32>
    %608 = arith.addf %516, %607 : vector<2x128xf32>
    %c5_i32_131 = arith.constant 5 : i32
    %609 = vector.broadcast %c5_i32_131 : i32 to vector<2x128xi32>
    %610 = arith.cmpi eq, %66, %609 : vector<2x128xi32>
    %611 = vector.shape_cast %538 : vector<2x1xi32> to vector<2x1xi32>
    %612 = vector.broadcast %611 : vector<2x1xi32> to vector<2x128xi32>
    %613 = arith.select %610, %612, %526 : vector<2x128xi1>, vector<2x128xi32>
    %c13_i32_132 = arith.constant 13 : i32
    %614 = vector.broadcast %c13_i32_132 : i32 to vector<2x128xi32>
    %615 = arith.cmpi eq, %66, %614 : vector<2x128xi32>
    %616 = vector.shape_cast %565 : vector<2x1xi32> to vector<2x1xi32>
    %617 = vector.broadcast %616 : vector<2x1xi32> to vector<2x128xi32>
    %618 = arith.select %615, %617, %613 : vector<2x128xi1>, vector<2x128xi32>
    %cst_133 = arith.constant 5.000000e-01 : f32
    %619 = vector.broadcast %cst_133 : f32 to vector<2x8xf32>
    %620 = arith.cmpf ogt, %582, %619 : vector<2x8xf32>
    %cst_134 = arith.constant -1.000000e+09 : f32
    %621 = vector.broadcast %cst_134 : f32 to vector<2x8xf32>
    %622 = arith.select %620, %621, %51 : vector<2x8xi1>, vector<2x8xf32>
    %cst_135 = arith.constant dense<0xFF800000> : vector<2xf32>
    %623 = vector.multi_reduction <maximumf>, %622, %cst_135 [1] : vector<2x8xf32> to vector<2xf32>
    %624 = vector.shape_cast %623 : vector<2xf32> to vector<2x1xf32>
    %625 = vector.broadcast %624 : vector<2x1xf32> to vector<2x8xf32>
    %626 = arith.cmpf oge, %622, %625 : vector<2x8xf32>
    %c8_i32_136 = arith.constant 8 : i32
    %627 = vector.broadcast %c8_i32_136 : i32 to vector<2x8xi32>
    %628 = arith.select %626, %64, %627 : vector<2x8xi1>, vector<2x8xi32>
    %cst_137 = arith.constant dense<2147483647> : vector<2xi32>
    %629 = vector.multi_reduction <minsi>, %628, %cst_137 [1] : vector<2x8xi32> to vector<2xi32>
    %630 = vector.shape_cast %629 : vector<2xi32> to vector<2x1xi32>
    %631 = vector.broadcast %630 : vector<2x1xi32> to vector<2x8xi32>
    %632 = arith.cmpi eq, %64, %631 : vector<2x8xi32>
    %633 = arith.extui %632 : vector<2x8xi1> to vector<2x8xi32>
    %634 = arith.sitofp %633 : vector<2x8xi32> to vector<2x8xf32>
    %635 = vector.broadcast %624 : vector<2x1xf32> to vector<2x8xf32>
    %636 = arith.subf %622, %635 : vector<2x8xf32>
    %637 = math.exp %636 : vector<2x8xf32>
    %cst_138 = arith.constant dense<0.000000e+00> : vector<2xf32>
    %638 = vector.multi_reduction <add>, %637, %cst_138 [1] : vector<2x8xf32> to vector<2xf32>
    %639 = vector.shape_cast %638 : vector<2xf32> to vector<2x1xf32>
    %640 = tpu.reciprocal %639 {approx = true} : vector<2x1xf32> -> vector<2x1xf32>
    %cst_139 = arith.constant 1.000000e+00 : f32
    %641 = vector.broadcast %cst_139 : f32 to vector<2x1xf32>
    %642 = arith.minimumf %640, %641 : vector<2x1xf32>
    %643 = arith.mulf %634, %56 : vector<2x8xf32>
    %cst_140 = arith.constant dense<0.000000e+00> : vector<2xf32>
    %644 = vector.multi_reduction <add>, %643, %cst_140 [1] : vector<2x8xf32> to vector<2xf32>
    %645 = vector.shape_cast %644 : vector<2xf32> to vector<2x1xf32>
    %646 = vector.broadcast %645 : vector<2x1xf32> to vector<2x16xf32>
    %647 = arith.mulf %646, %8 : vector<2x16xf32>
    %648 = arith.addf %585, %647 : vector<2x16xf32>
    %649 = arith.subf %11, %648 : vector<2x16xf32>
    %cst_141 = arith.constant dense<0xFF800000> : vector<2xf32>
    %650 = vector.multi_reduction <maximumf>, %649, %cst_141 [1] : vector<2x16xf32> to vector<2xf32>
    %651 = vector.shape_cast %650 : vector<2xf32> to vector<2x1xf32>
    %652 = vector.broadcast %651 : vector<2x1xf32> to vector<2x16xf32>
    %653 = arith.cmpf oge, %649, %652 : vector<2x16xf32>
    %c16_i32_142 = arith.constant 16 : i32
    %654 = vector.broadcast %c16_i32_142 : i32 to vector<2x16xi32>
    %655 = arith.select %653, %65, %654 : vector<2x16xi1>, vector<2x16xi32>
    %cst_143 = arith.constant dense<2147483647> : vector<2xi32>
    %656 = vector.multi_reduction <minsi>, %655, %cst_143 [1] : vector<2x16xi32> to vector<2xi32>
    %657 = vector.shape_cast %656 : vector<2xi32> to vector<2x1xi32>
    %658 = vector.broadcast %657 : vector<2x1xi32> to vector<2x16xi32>
    %659 = arith.cmpi eq, %65, %658 : vector<2x16xi32>
    %660 = arith.extui %659 : vector<2x16xi1> to vector<2x16xi32>
    %661 = arith.sitofp %660 : vector<2x16xi32> to vector<2x16xf32>
    %662 = vector.broadcast %651 : vector<2x1xf32> to vector<2x16xf32>
    %663 = arith.subf %649, %662 : vector<2x16xf32>
    %664 = math.exp %663 : vector<2x16xf32>
    %cst_144 = arith.constant dense<0.000000e+00> : vector<2xf32>
    %665 = vector.multi_reduction <add>, %664, %cst_144 [1] : vector<2x16xf32> to vector<2xf32>
    %666 = vector.shape_cast %665 : vector<2xf32> to vector<2x1xf32>
    %667 = tpu.reciprocal %666 {approx = true} : vector<2x1xf32> -> vector<2x1xf32>
    %cst_145 = arith.constant 1.000000e+00 : f32
    %668 = vector.broadcast %cst_145 : f32 to vector<2x1xf32>
    %669 = arith.minimumf %667, %668 : vector<2x1xf32>
    %670 = arith.mulf %661, %8 : vector<2x16xf32>
    %cst_146 = arith.constant dense<0.000000e+00> : vector<2xf32>
    %671 = vector.multi_reduction <add>, %670, %cst_146 [1] : vector<2x16xf32> to vector<2xf32>
    %672 = vector.shape_cast %671 : vector<2xf32> to vector<2x1xf32>
    %673 = arith.mulf %645, %672 : vector<2x1xf32>
    %674 = arith.addf %582, %634 : vector<2x8xf32>
    %675 = vector.broadcast %673 : vector<2x1xf32> to vector<2x16xf32>
    %676 = arith.mulf %661, %675 : vector<2x16xf32>
    %677 = arith.addf %585, %676 : vector<2x16xf32>
    %cst_147 = arith.constant dense<0.000000e+00> : vector<16xf32>
    %678 = vector.multi_reduction <add>, %661, %cst_147 [0] : vector<2x16xf32> to vector<16xf32>
    %679 = vector.shape_cast %678 : vector<16xf32> to vector<1x16xf32>
    %680 = arith.addf %588, %679 : vector<1x16xf32>
    %681 = arith.subf %589, %673 : vector<2x1xf32>
    %682 = arith.mulf %661, %14 : vector<2x16xf32>
    %cst_148 = arith.constant dense<0.000000e+00> : vector<2xf32>
    %683 = vector.multi_reduction <add>, %682, %cst_148 [1] : vector<2x16xf32> to vector<2xf32>
    %684 = vector.shape_cast %683 : vector<2xf32> to vector<2x1xf32>
    %685 = arith.mulf %673, %684 : vector<2x1xf32>
    %cst_149 = arith.constant dense<0.000000e+00> : vector<1xf32>
    %686 = vector.multi_reduction <add>, %685, %cst_149 [0] : vector<2x1xf32> to vector<1xf32>
    %687 = vector.shape_cast %686 : vector<1xf32> to vector<1x1xf32>
    %688 = arith.addf %596, %687 : vector<1x1xf32>
    %c6_i32 = arith.constant 6 : i32
    %689 = vector.broadcast %c6_i32 : i32 to vector<2x128xi32>
    %690 = arith.cmpi eq, %66, %689 : vector<2x128xi32>
    %c14_i32 = arith.constant 14 : i32
    %691 = vector.broadcast %c14_i32 : i32 to vector<2x128xi32>
    %692 = arith.cmpi eq, %66, %691 : vector<2x128xi32>
    %cst_150 = arith.constant 0.000000e+00 : f32
    %693 = vector.shape_cast %669 : vector<2x1xf32> to vector<2x1xf32>
    %694 = vector.broadcast %693 : vector<2x1xf32> to vector<2x128xf32>
    %695 = vector.broadcast %cst_150 : f32 to vector<2x128xf32>
    %696 = arith.select %692, %694, %695 : vector<2x128xi1>, vector<2x128xf32>
    %697 = vector.shape_cast %642 : vector<2x1xf32> to vector<2x1xf32>
    %698 = vector.broadcast %697 : vector<2x1xf32> to vector<2x128xf32>
    %699 = arith.select %690, %698, %696 : vector<2x128xi1>, vector<2x128xf32>
    %700 = arith.addf %608, %699 : vector<2x128xf32>
    %c6_i32_151 = arith.constant 6 : i32
    %701 = vector.broadcast %c6_i32_151 : i32 to vector<2x128xi32>
    %702 = arith.cmpi eq, %66, %701 : vector<2x128xi32>
    %703 = vector.shape_cast %630 : vector<2x1xi32> to vector<2x1xi32>
    %704 = vector.broadcast %703 : vector<2x1xi32> to vector<2x128xi32>
    %705 = arith.select %702, %704, %618 : vector<2x128xi1>, vector<2x128xi32>
    %c14_i32_152 = arith.constant 14 : i32
    %706 = vector.broadcast %c14_i32_152 : i32 to vector<2x128xi32>
    %707 = arith.cmpi eq, %66, %706 : vector<2x128xi32>
    %708 = vector.shape_cast %657 : vector<2x1xi32> to vector<2x1xi32>
    %709 = vector.broadcast %708 : vector<2x1xi32> to vector<2x128xi32>
    %710 = arith.select %707, %709, %705 : vector<2x128xi1>, vector<2x128xi32>
    %cst_153 = arith.constant 5.000000e-01 : f32
    %711 = vector.broadcast %cst_153 : f32 to vector<2x8xf32>
    %712 = arith.cmpf ogt, %674, %711 : vector<2x8xf32>
    %cst_154 = arith.constant -1.000000e+09 : f32
    %713 = vector.broadcast %cst_154 : f32 to vector<2x8xf32>
    %714 = arith.select %712, %713, %51 : vector<2x8xi1>, vector<2x8xf32>
    %cst_155 = arith.constant dense<0xFF800000> : vector<2xf32>
    %715 = vector.multi_reduction <maximumf>, %714, %cst_155 [1] : vector<2x8xf32> to vector<2xf32>
    %716 = vector.shape_cast %715 : vector<2xf32> to vector<2x1xf32>
    %717 = vector.broadcast %716 : vector<2x1xf32> to vector<2x8xf32>
    %718 = arith.cmpf oge, %714, %717 : vector<2x8xf32>
    %c8_i32_156 = arith.constant 8 : i32
    %719 = vector.broadcast %c8_i32_156 : i32 to vector<2x8xi32>
    %720 = arith.select %718, %64, %719 : vector<2x8xi1>, vector<2x8xi32>
    %cst_157 = arith.constant dense<2147483647> : vector<2xi32>
    %721 = vector.multi_reduction <minsi>, %720, %cst_157 [1] : vector<2x8xi32> to vector<2xi32>
    %722 = vector.shape_cast %721 : vector<2xi32> to vector<2x1xi32>
    %723 = vector.broadcast %722 : vector<2x1xi32> to vector<2x8xi32>
    %724 = arith.cmpi eq, %64, %723 : vector<2x8xi32>
    %725 = arith.extui %724 : vector<2x8xi1> to vector<2x8xi32>
    %726 = arith.sitofp %725 : vector<2x8xi32> to vector<2x8xf32>
    %727 = vector.broadcast %716 : vector<2x1xf32> to vector<2x8xf32>
    %728 = arith.subf %714, %727 : vector<2x8xf32>
    %729 = math.exp %728 : vector<2x8xf32>
    %cst_158 = arith.constant dense<0.000000e+00> : vector<2xf32>
    %730 = vector.multi_reduction <add>, %729, %cst_158 [1] : vector<2x8xf32> to vector<2xf32>
    %731 = vector.shape_cast %730 : vector<2xf32> to vector<2x1xf32>
    %732 = tpu.reciprocal %731 {approx = true} : vector<2x1xf32> -> vector<2x1xf32>
    %cst_159 = arith.constant 1.000000e+00 : f32
    %733 = vector.broadcast %cst_159 : f32 to vector<2x1xf32>
    %734 = arith.minimumf %732, %733 : vector<2x1xf32>
    %735 = arith.mulf %726, %56 : vector<2x8xf32>
    %cst_160 = arith.constant dense<0.000000e+00> : vector<2xf32>
    %736 = vector.multi_reduction <add>, %735, %cst_160 [1] : vector<2x8xf32> to vector<2xf32>
    %737 = vector.shape_cast %736 : vector<2xf32> to vector<2x1xf32>
    %738 = vector.broadcast %737 : vector<2x1xf32> to vector<2x16xf32>
    %739 = arith.mulf %738, %8 : vector<2x16xf32>
    %740 = arith.addf %677, %739 : vector<2x16xf32>
    %741 = arith.subf %11, %740 : vector<2x16xf32>
    %cst_161 = arith.constant dense<0xFF800000> : vector<2xf32>
    %742 = vector.multi_reduction <maximumf>, %741, %cst_161 [1] : vector<2x16xf32> to vector<2xf32>
    %743 = vector.shape_cast %742 : vector<2xf32> to vector<2x1xf32>
    %744 = vector.broadcast %743 : vector<2x1xf32> to vector<2x16xf32>
    %745 = arith.cmpf oge, %741, %744 : vector<2x16xf32>
    %c16_i32_162 = arith.constant 16 : i32
    %746 = vector.broadcast %c16_i32_162 : i32 to vector<2x16xi32>
    %747 = arith.select %745, %65, %746 : vector<2x16xi1>, vector<2x16xi32>
    %cst_163 = arith.constant dense<2147483647> : vector<2xi32>
    %748 = vector.multi_reduction <minsi>, %747, %cst_163 [1] : vector<2x16xi32> to vector<2xi32>
    %749 = vector.shape_cast %748 : vector<2xi32> to vector<2x1xi32>
    %750 = vector.broadcast %749 : vector<2x1xi32> to vector<2x16xi32>
    %751 = arith.cmpi eq, %65, %750 : vector<2x16xi32>
    %752 = arith.extui %751 : vector<2x16xi1> to vector<2x16xi32>
    %753 = arith.sitofp %752 : vector<2x16xi32> to vector<2x16xf32>
    %754 = vector.broadcast %743 : vector<2x1xf32> to vector<2x16xf32>
    %755 = arith.subf %741, %754 : vector<2x16xf32>
    %756 = math.exp %755 : vector<2x16xf32>
    %cst_164 = arith.constant dense<0.000000e+00> : vector<2xf32>
    %757 = vector.multi_reduction <add>, %756, %cst_164 [1] : vector<2x16xf32> to vector<2xf32>
    %758 = vector.shape_cast %757 : vector<2xf32> to vector<2x1xf32>
    %759 = tpu.reciprocal %758 {approx = true} : vector<2x1xf32> -> vector<2x1xf32>
    %cst_165 = arith.constant 1.000000e+00 : f32
    %760 = vector.broadcast %cst_165 : f32 to vector<2x1xf32>
    %761 = arith.minimumf %759, %760 : vector<2x1xf32>
    %762 = arith.mulf %753, %8 : vector<2x16xf32>
    %cst_166 = arith.constant dense<0.000000e+00> : vector<2xf32>
    %763 = vector.multi_reduction <add>, %762, %cst_166 [1] : vector<2x16xf32> to vector<2xf32>
    %764 = vector.shape_cast %763 : vector<2xf32> to vector<2x1xf32>
    %765 = arith.mulf %737, %764 : vector<2x1xf32>
    %cst_167 = arith.constant dense<0.000000e+00> : vector<16xf32>
    %766 = vector.multi_reduction <add>, %753, %cst_167 [0] : vector<2x16xf32> to vector<16xf32>
    %767 = vector.shape_cast %766 : vector<16xf32> to vector<1x16xf32>
    %768 = arith.addf %680, %767 : vector<1x16xf32>
    %769 = arith.subf %681, %765 : vector<2x1xf32>
    %770 = arith.mulf %753, %14 : vector<2x16xf32>
    %cst_168 = arith.constant dense<0.000000e+00> : vector<2xf32>
    %771 = vector.multi_reduction <add>, %770, %cst_168 [1] : vector<2x16xf32> to vector<2xf32>
    %772 = vector.shape_cast %771 : vector<2xf32> to vector<2x1xf32>
    %773 = arith.mulf %765, %772 : vector<2x1xf32>
    %cst_169 = arith.constant dense<0.000000e+00> : vector<1xf32>
    %774 = vector.multi_reduction <add>, %773, %cst_169 [0] : vector<2x1xf32> to vector<1xf32>
    %775 = vector.shape_cast %774 : vector<1xf32> to vector<1x1xf32>
    %776 = arith.addf %688, %775 : vector<1x1xf32>
    %c7_i32 = arith.constant 7 : i32
    %777 = vector.broadcast %c7_i32 : i32 to vector<2x128xi32>
    %778 = arith.cmpi eq, %66, %777 : vector<2x128xi32>
    %c15_i32 = arith.constant 15 : i32
    %779 = vector.broadcast %c15_i32 : i32 to vector<2x128xi32>
    %780 = arith.cmpi eq, %66, %779 : vector<2x128xi32>
    %cst_170 = arith.constant 0.000000e+00 : f32
    %781 = vector.shape_cast %761 : vector<2x1xf32> to vector<2x1xf32>
    %782 = vector.broadcast %781 : vector<2x1xf32> to vector<2x128xf32>
    %783 = vector.broadcast %cst_170 : f32 to vector<2x128xf32>
    %784 = arith.select %780, %782, %783 : vector<2x128xi1>, vector<2x128xf32>
    %785 = vector.shape_cast %734 : vector<2x1xf32> to vector<2x1xf32>
    %786 = vector.broadcast %785 : vector<2x1xf32> to vector<2x128xf32>
    %787 = arith.select %778, %786, %784 : vector<2x128xi1>, vector<2x128xf32>
    %788 = arith.addf %700, %787 : vector<2x128xf32>
    %c7_i32_171 = arith.constant 7 : i32
    %789 = vector.broadcast %c7_i32_171 : i32 to vector<2x128xi32>
    %790 = arith.cmpi eq, %66, %789 : vector<2x128xi32>
    %791 = vector.shape_cast %722 : vector<2x1xi32> to vector<2x1xi32>
    %792 = vector.broadcast %791 : vector<2x1xi32> to vector<2x128xi32>
    %793 = arith.select %790, %792, %710 : vector<2x128xi1>, vector<2x128xi32>
    %c15_i32_172 = arith.constant 15 : i32
    %794 = vector.broadcast %c15_i32_172 : i32 to vector<2x128xi32>
    %795 = arith.cmpi eq, %66, %794 : vector<2x128xi32>
    %796 = vector.shape_cast %749 : vector<2x1xi32> to vector<2x1xi32>
    %797 = vector.broadcast %796 : vector<2x1xi32> to vector<2x128xi32>
    %798 = arith.select %795, %797, %793 : vector<2x128xi1>, vector<2x128xi32>
    %cst_173 = arith.constant dense<0.000000e+00> : vector<1xf32>
    %799 = vector.multi_reduction <add>, %768, %cst_173 [1] : vector<1x16xf32> to vector<1xf32>
    %800 = vector.shape_cast %799 : vector<1xf32> to vector<1x1xf32>
    %cst_174 = arith.constant 1.600000e+01 : f32
    %801 = vector.broadcast %cst_174 : f32 to vector<1x1xf32>
    %802 = arith.divf %800, %801 : vector<1x1xf32>
    %803 = vector.broadcast %802 : vector<1x1xf32> to vector<1x16xf32>
    %804 = arith.subf %768, %803 : vector<1x16xf32>
    %805 = arith.mulf %804, %804 : vector<1x16xf32>
    %cst_175 = arith.constant dense<0.000000e+00> : vector<1xf32>
    %806 = vector.multi_reduction <add>, %805, %cst_175 [1] : vector<1x16xf32> to vector<1xf32>
    %807 = vector.shape_cast %806 : vector<1xf32> to vector<1x1xf32>
    %cst_176 = arith.constant 1.600000e+01 : f32
    %808 = vector.broadcast %cst_176 : f32 to vector<1x1xf32>
    %809 = arith.divf %807, %808 : vector<1x1xf32>
    %810 = math.sqrt %809 : vector<1x1xf32>
    %811 = arith.divf %810, %802 : vector<1x1xf32>
    %cst_177 = arith.constant 1.000000e+02 : f32
    %812 = vector.broadcast %cst_177 : f32 to vector<1x1xf32>
    %813 = arith.mulf %811, %812 : vector<1x1xf32>
    %c16_i32_178 = arith.constant 16 : i32
    %814 = vector.broadcast %c16_i32_178 : i32 to vector<2x128xi32>
    %815 = arith.cmpi eq, %66, %814 : vector<2x128xi32>
    %cst_179 = arith.constant 0.000000e+00 : f32
    %816 = vector.shape_cast %769 : vector<2x1xf32> to vector<2x1xf32>
    %817 = vector.broadcast %816 : vector<2x1xf32> to vector<2x128xf32>
    %818 = vector.broadcast %cst_179 : f32 to vector<2x128xf32>
    %819 = arith.select %815, %817, %818 : vector<2x128xi1>, vector<2x128xf32>
    %820 = arith.addf %788, %819 : vector<2x128xf32>
    %c17_i32 = arith.constant 17 : i32
    %821 = vector.broadcast %c17_i32 : i32 to vector<2x128xi32>
    %822 = arith.cmpi eq, %66, %821 : vector<2x128xi32>
    %cst_180 = arith.constant 0.000000e+00 : f32
    %823 = vector.shape_cast %813 : vector<1x1xf32> to vector<1x1xf32>
    %824 = vector.broadcast %823 : vector<1x1xf32> to vector<2x128xf32>
    %825 = vector.broadcast %cst_180 : f32 to vector<2x128xf32>
    %826 = arith.select %822, %824, %825 : vector<2x128xi1>, vector<2x128xf32>
    %827 = arith.addf %820, %826 : vector<2x128xf32>
    %c18_i32 = arith.constant 18 : i32
    %828 = vector.broadcast %c18_i32 : i32 to vector<2x128xi32>
    %829 = arith.cmpi eq, %66, %828 : vector<2x128xi32>
    %cst_181 = arith.constant 0.000000e+00 : f32
    %830 = vector.shape_cast %776 : vector<1x1xf32> to vector<1x1xf32>
    %831 = vector.broadcast %830 : vector<1x1xf32> to vector<2x128xf32>
    %832 = vector.broadcast %cst_181 : f32 to vector<2x128xf32>
    %833 = arith.select %829, %831, %832 : vector<2x128xi1>, vector<2x128xf32>
    %834 = arith.addf %827, %833 : vector<2x128xf32>
    %c0_182 = arith.constant 0 : index
    %c0_183 = arith.constant 0 : index
    %835 = vector.load %arg3[%c0_182, %c0_183] : memref<2x128xf32, #tpu.memory_space<vmem>>, vector<2x128xf32>
    tpu.vector_store %arg3[%c0_182, %c0_183], %834 {strides = array<i32>} : memref<2x128xf32, #tpu.memory_space<vmem>>, vector<2x128xf32>,
    %c0_184 = arith.constant 0 : index
    %c0_185 = arith.constant 0 : index
    %836 = vector.load %arg4[%c0_184, %c0_185] : memref<2x128xi32, #tpu.memory_space<vmem>>, vector<2x128xi32>
    tpu.vector_store %arg4[%c0_184, %c0_185], %798 {strides = array<i32>} : memref<2x128xi32, #tpu.memory_space<vmem>>, vector<2x128xi32>,
    return
  }
}

</mosaic_0001>

<bundles_post_ra>
// kernel: tpu_custom_call.1
= control target key start
LH: loop header
LB: loop body
LE: loop exit
PB: predicated region body
PF: predicated region fallthrough
CT: control target
= control target key end

     0   :  { %10 = vsyncpa [#allocation3], 0  ;;  %v1308_v1 = vmov 1   ;;  %v1309_v2 = vmov 0   ;;  %s2060_s0 = inlined_call_operand.vmem [shape: f32[2,8,4], index: 0, kind: input, shape index: {}]   ;;  %s2061_s1 = inlined_call_operand.vmem [shape: f32[7,32], index: 1, kind: input, shape index: {}]   ;;  %s2062_s2 = inlined_call_operand.vmem [shape: f32[3,16], index: 2, kind: input, shape index: {}]   ;;  %s2063_s3 = inlined_call_operand.hbm [shape: f32[2,128], index: 3, kind: output, shape index: {0}]   ;;  %s2064_s4 = inlined_call_operand.hbm [shape: s32[2,128], index: 4, kind: output, shape index: {1}]  }
   0x1   :  { %v1343_v0 = vld [vmem:[%s2060_s0] sm:$0xff]  ;;  %1179 = vset.pattern.permute.xlu1 %v1308_v1  ;;  %1178 = vset.pattern.permute.xlu0 %v1309_v2 }
   0x2   :  { %11 = vsyncpa [#allocation5], 0  ;;  %57 = vperm.xlu1 %1179, %v1343_v0   ;;  %36 = vperm.xlu0 %1178, %v1343_v0   ;;  %v1350_v3 = vld [vmem:[%s2060_s0 + $0x8] sm:$0xff]  ;;  %v22_v4 = vlaneseq  ;;  %v1310_v7 = vmov 2   ;;  %v1361_v8 = vld [vmem:[%s2062_s2] sm:$0x7] }
   0x3   :  { %v1311_v10 = vmov 3   ;;  %v20_v11 = vld [vmem:[%s2061_s1] sm:$0x7f]  ;;  %vm112_vm0 = vcmask 261120   ;;  %vm145_vm1 = vcmask 1041409   ;;  %vm148_vm2 = vcmask 58368  }
   0x4   :  { %v1355_v5 = vshrl.u32 %v22_v4, 7  ;;  %v120_v12 = vrot.slane %v20_v11, 6  ;;  %v1385_v54 = vand.u32 127, %v22_v4  ;;  %vm257_vm8 = vcmask 123904   ;;  %s1313_s2 = smov [#allocation4]  }
   0x5   :  { %s1141_s22 = sshll.u32 %s1313_s2, 4  ;;  %s1142_s22 = int_to_ptr.vmem [resolvable:$true] %s1141_s22 }
   0x6   :  { %61 = vperm.xlu1 %1179, %v1350_v3   ;;  %41 = vperm.xlu0 %1178, %v1350_v3   ;;  %v32_v6 = vsub.s32 2, %v1355_v5  ;;  %1169 = vpush %v120_v12  ;;  %v1374_v13 = vsub.s32 0, %v1355_v5  ;;  %v52_v17 = vsub.s32 4, %v1355_v5  ;;  %v1379_v18 = vsub.s32 1, %v1355_v5  ;;  %s1260_s23 = scalar_lea.vmem %s1142_s22, 32  ;;  %p1265_p1 = scmp.lt.s32.totalorder %s1142_s22, %s1142_s22 }
   0x7   :  { %v98_v24 = vsub.s32 3, %v1355_v5  ;;  %v108_v46 = vsub.s32 5, %v1355_v5  ;;  %v1390_v56 = vsub.s32 %v1385_v54, %v1355_v5  ;;  %vm320_vm13 = vcmp.eq.s32.totalorder %v1385_v54, 0  ;;  %p1261_p0 = scmp.ne.s32.totalorder %s1142_s22, %s1260_s23  ;;  %p1266_p2 = scmp.lt.s32.totalorder %s1260_s23, %s1260_s23 }
   0x8   :  { %v1366_v9 = vrot.slane %v1361_v8, %v32_v6  ;;  %v47_v16 = vrot.slane %v20_v11, %v1374_v13  ;;  %v53_v21 = vrot.slane %v20_v11, %v52_v17  ;;  %v67_v25 = vrot.slane %v20_v11, %v1379_v18 }
   0x9   :  { %v83_v27 = vrot.slane %v20_v11, %v32_v6  ;;  %v99_v32 = vrot.slane %v20_v11, %v98_v24  ;;  %v109_v47 = vrot.slane %v20_v11, %v108_v46  ;;  %vm321_vm14 = vcmp.eq.s32.totalorder %v1385_v54, 8  ;;  %p1267_p3 = por %p1266_p2, %p1265_p1 }
   0xa   :  { %1181 = vset.pattern.permute.xlu1 %v1310_v7  ;;  %1180 = vset.pattern.permute.xlu0 %v1310_v7 }
   0xb   :  { %77 = vperm.xlu1 %1181, %v1350_v3   ;;  %73 = vperm.xlu0 %1180, %v1343_v0   ;;  %p1268_p4 = pnand %p1267_p3, %p1261_p0 }
   0xf   :  { %1182 = vset.pattern.permute.xlu1 %v1311_v10  ;;  %1183 = vset.pattern.permute.xlu0 %v1311_v10 }
  0x10   :  { %89 = vperm.xlu1 %1182, %v1343_v0   ;;  %93 = vperm.xlu0 %1183, %v1350_v3  }
  0x14   :  { %1184 = vset.pattern.permute.xlu1 %v1309_v2  ;;  %1185 = vset.pattern.permute.xlu0 %v1309_v2 }
  0x37   :  { %s1170_s1 = spop %1169 }
  0x38   :  { %v122_v55 = vstv %s1170_s1 }
  0x81   :  { %v58_v14 = vpop.permute.xlu1 %57  ;;  %v37_v15 = vpop.permute.xlu0 %36 }
  0x82   :  { %v48_v22 = vmul.f32 %v47_v16, %v37_v15  ;;  %v68_v33 = vmul.f32 %v67_v25, %v58_v14 }
  0x84   :  { %v54_v28 = vadd.f32 %v53_v21, %v48_v22 }
  0x85   :  { %v62_v19 = vpop.permute.xlu1 %61  ;;  %v42_v20 = vpop.permute.xlu0 %41 }
  0x86   :  { %v49_v23 = vmul.f32 %v47_v16, %v42_v20  ;;  %v69_v29 = vmul.f32 %v67_v25, %v62_v19  ;;  %v70_v37 = vadd.f32 %v68_v33, %v54_v28 }
  0x88   :  { %v55_v26 = vadd.f32 %v53_v21, %v49_v23  ;;  %v126_v21 = vand.u32 2147483647, %v1343_v0 }
  0x8a   :  { %v78_v30 = vpop.permute.xlu1 %77  ;;  %v74_v31 = vpop.permute.xlu0 %73  ;;  %v71_v34 = vadd.f32 %v69_v29, %v55_v26  ;;  %v128_v22 = vadd.f32 0.1, %v126_v21 }
  0x8b   :  { %v85_v35 = vmul.f32 %v83_v27, %v78_v30  ;;  %v84_v36 = vmul.f32 %v83_v27, %v74_v31  ;;  %v127_v27 = vand.u32 2147483647, %v1350_v3 }
  0x8d   :  { %v87_v40 = vadd.f32 %v85_v35, %v71_v34  ;;  %v86_v41 = vadd.f32 %v84_v36, %v70_v37  ;;  %v129_v28 = vadd.f32 0.1, %v127_v27  ;;  %v2065_v37 = vmov 0.0  }
  0x8f   :  { %v90_v38 = vpop.permute.xlu1 %89  ;;  %v94_v39 = vpop.permute.xlu0 %93 }
  0x90   :  { %v100_v42 = vmul.f32 %v99_v32, %v90_v38  ;;  %v101_v43 = vmul.f32 %v99_v32, %v94_v39 }
  0x92   :  { %v102_v44 = vadd.f32 %v100_v42, %v86_v41  ;;  %v103_v45 = vadd.f32 %v101_v43, %v87_v40  ;;  %v1441_v43 = vrot.slane %v1361_v8, %v1374_v13 }
  0x94   :  { %1186 = vtanh.f32 %v102_v44  ;;  %2097 = vst [vmem:[#allocation8_spill] sm:$0xff] %v1441_v43  ;;  %v1445_v44 = vrot.slane %v1361_v8, %v1379_v18 }
  0x95   :  { %1188 = vtanh.f32 %v103_v45 }
  0x9e   :  { %v1187_v48 = vpop.eup %1186 }
  0x9f   :  { %v1189_v49 = vpop.eup %1188  ;;  %v110_v50 = vmul.f32 %v1187_v48, %v109_v47 }
  0xa0   :  { %v111_v51 = vmul.f32 %v1189_v49, %v109_v47 }
  0xa1   :  { %v113_v52 = vsel %vm112_vm0, %v110_v50, 0.0 }
  0xa2   :  { %114 = vadd.xlane.f32.xlu1 %v113_v52  ;;  %v116_v53 = vsel %vm112_vm0, %v111_v51, 0.0  ;;  %vm440_vm0 = vcmp.eq.s32.totalorder %v1385_v54, 1 }
  0xa3   :  { %117 = vadd.xlane.f32.xlu0 %v116_v53 }
  0xb9   :  { %166 = vbcast.lane.b32.xlu0 %v1385_v54, 256 }
 0x12f   :  { %v115_v57 = vpop.xlane.xlu1 %114 }
 0x130   :  { %v1392_v58 = vadd.f32 %v122_v55, %v115_v57  ;;  %v118_v59 = vpop.xlane.xlu0 %117 }
 0x131   :  { %v1394_v60 = vadd.f32 %v122_v55, %v118_v59 }
 0x132   :  { %v140_v61 = vrot.slane %v1392_v58, %v1390_v56 }
 0x133   :  { %v144_v62 = vrot.slane %v1394_v60, %v1390_v56 }
 0x134   :  { %v167_v6 = vpop.permute.xlu0 %166 }
 0x135   :  { %v1401_v63 = vsel %vm145_vm1, %v144_v62, %v140_v61 }
 0x136   :  { %v149_v1 = vsel %vm148_vm2, %v1401_v63, -inf }
 0x137   :  { %150 = vmax.xlane.f32.xlu1 %v149_v1 }
 0x1c4   :  { %v151_v2 = vpop.xlane.xlu1 %150 }
 0x1c5   :  { %v1406_v4 = vrot.slane %v151_v2, %v1374_v13  ;;  %v1409_v5 = vrot.slane %v151_v2, %v1379_v18 }
 0x1c7   :  { %vm163_vm3 = vcmp.ge.f32.partialorder %v1392_v58, %v1406_v4  ;;  %vm164_vm4 = vcmp.ge.f32.partialorder %v1394_v60, %v1409_v5 }
 0x1c8   :  { %v168_v7 = vsel %vm163_vm3, %v167_v6, 8  ;;  %v169_v10 = vsel %vm164_vm4, %v167_v6, 8 }
 0x1c9   :  { %171 = vperm.xlu1 %1184, %v168_v7  }
 0x1cd   :  { %174 = vperm.xlu1 %1184, %v169_v10  }
 0x248   :  { %v172_v11 = vpop.permute.xlu1 %171 }
 0x249   :  { %v179_v14 = vrot.slane %v172_v11, %v1390_v56 }
 0x24c   :  { %v175_v12 = vpop.permute.xlu1 %174 }
 0x24d   :  { %v183_v15 = vrot.slane %v175_v12, %v1390_v56 }
 0x24f   :  { %v184_v16 = vsel %vm145_vm1, %v183_v15, %v179_v14 }
 0x250   :  { %v185_v17 = vsel %vm148_vm2, %v184_v16, 2147483647 }
 0x251   :  { %v187_v19 = vshra.s32 %v185_v17, 16  ;;  %v186_v23 = vand.u32 65535, %v185_v17 }
 0x253   :  { %v189_v20 = vcvt.s32.f32 %v187_v19  ;;  %v188_v25 = vcvt.s32.f32 %v186_v23 }
 0x255   :  { %190 = vmin.xlane.f32.xlu0 %v189_v20 }
 0x26b   :  { %235 = vperm.xlu0 %1185, %v128_v22  }
 0x2e2   :  { %v191_v24 = vpop.xlane.xlu0 %190 }
 0x2e3   :  { %vm192_vm5 = vcmp.eq.f32.partialorder %v189_v20, %v191_v24  ;;  %v197_v29 = vcvt.f32.s32 %v191_v24 }
 0x2e4   :  { %v193_v26 = vsel %vm192_vm5, %v188_v25, inf }
 0x2e5   :  { %194 = vmin.xlane.f32.xlu1 %v193_v26  ;;  %v198_v32 = vshll.u32 %v197_v29, 16 }
 0x2ea   :  { %v236_v31 = vpop.permute.xlu0 %235 }
 0x2eb   :  { %v243_v0 = vrot.slane %v236_v31, %v1390_v56 }
 0x2f6   :  { %238 = vperm.xlu1 %1184, %v129_v28  }
 0x372   :  { %v195_v30 = vpop.xlane.xlu1 %194 }
 0x373   :  { %v196_v33 = vcvt.f32.s32 %v195_v30 }
 0x375   :  { %v199_v34 = vadd.s32 %v198_v32, %v196_v33 }
 0x376   :  { %v239_v35 = vpop.permute.xlu1 %238 }
 0x377   :  { %vm200_vm6 = vcmp.eq.s32.totalorder %v1385_v54, %v199_v34  ;;  %v247_v36 = vrot.slane %v239_v35, %v1390_v56  ;;  %v325_v19 = vsel %vm320_vm13, %v199_v34, 0 }
 0x378   :  { %v1425_v38 = vsel %vm200_vm6, 1.0, %v2065_v37 }
 0x379   :  { %v1428_v3 = vsel %vm145_vm1, %v247_v36, %v243_v0  ;;  %vm327_vm7 = vcmp.gt.f32.partialorder %v1425_v38, 0.5 }
 0x37a   :  { %v250_v39 = vmul.f32 %v1425_v38, %v1428_v3  ;;  %v1435_v41 = vsel %vm327_vm7, -1e+09, %v1401_v63 }
 0x37b   :  { %v341_v42 = vsel %vm148_vm2, %v1435_v41, -inf }
 0x37c   :  { %v251_v40 = vsel %vm148_vm2, %v250_v39, 0.0 }
 0x37d   :  { %252 = vadd.xlane.f32.xlu1 %v251_v40 }
 0x381   :  { %342 = vmax.xlane.f32.xlu1 %v341_v42 }
 0x40a   :  { %v1447_v45 = vpop.xlane.xlu1 %252 }
 0x40b   :  { %v254_v46 = vmul.f32 %v1447_v45, %v1441_v43 }
 0x40d   :  { %v1452_v47 = vsub.f32 %v1445_v44, %v254_v46 }
 0x40e   :  { %v1456_v49 = vpop.xlane.xlu1 %342 }
 0x40f   :  { %v258_v48 = vsel %vm257_vm8, %v1452_v47, -inf  ;;  %vm344_vm9 = vcmp.ge.f32.partialorder %v1435_v41, %v1456_v49 }
 0x410   :  { %259 = vmax.xlane.f32.xlu0 %v258_v48  ;;  %v345_v8 = vsel %vm344_vm9, %v1385_v54, 8 }
 0x411   :  { %v346_v51 = vsel %vm148_vm2, %v345_v8, 2147483647 }
 0x412   :  { %v348_v55 = vshra.s32 %v346_v51, 16  ;;  %v347_v1 = vand.u32 65535, %v346_v51 }
 0x414   :  { %v350_v57 = vcvt.s32.f32 %v348_v55  ;;  %v349_v7 = vcvt.s32.f32 %v347_v1 }
 0x49d   :  { %v1461_v13 = vpop.xlane.xlu0 %259 }
 0x49e   :  { %vm261_vm10 = vcmp.ge.f32.partialorder %v1452_v47, %v1461_v13 }
 0x49f   :  { %v262_v18 = vsel %vm261_vm10, %v1385_v54, 16 }
 0x4a0   :  { %v263_v50 = vsel %vm257_vm8, %v262_v18, 2147483647 }
 0x4a1   :  { %v265_v52 = vshra.s32 %v263_v50, 16  ;;  %v264_v59 = vand.u32 65535, %v263_v50 }
 0x4a3   :  { %v267_v53 = vcvt.s32.f32 %v265_v52  ;;  %v266_v62 = vcvt.s32.f32 %v264_v59 }
 0x4a5   :  { %268 = vmin.xlane.f32.xlu1 %v267_v53 }
 0x4a9   :  { %351 = vmin.xlane.f32.xlu1 %v350_v57 }
 0x532   :  { %v269_v61 = vpop.xlane.xlu1 %268 }
 0x533   :  { %vm270_vm11 = vcmp.eq.f32.partialorder %v267_v53, %v269_v61  ;;  %v275_v11 = vcvt.f32.s32 %v269_v61 }
 0x534   :  { %v271_v2 = vsel %vm270_vm11, %v266_v62, inf }
 0x535   :  { %272 = vmin.xlane.f32.xlu1 %v271_v2  ;;  %v276_v14 = vshll.u32 %v275_v11, 16 }
 0x536   :  { %v352_v6 = vpop.xlane.xlu1 %351 }
 0x537   :  { %vm353_vm12 = vcmp.eq.f32.partialorder %v350_v57, %v352_v6  ;;  %v358_v15 = vcvt.f32.s32 %v352_v6 }
 0x538   :  { %v354_v10 = vsel %vm353_vm12, %v349_v7, inf  ;;  %vm441_vm12 = vcmp.eq.s32.totalorder %v1385_v54, 9 }
 0x539   :  { %355 = vmin.xlane.f32.xlu1 %v354_v10  ;;  %v359_v21 = vshll.u32 %v358_v15, 16 }
 0x5c2   :  { %v273_v12 = vpop.xlane.xlu1 %272 }
 0x5c3   :  { %v274_v16 = vcvt.f32.s32 %v273_v12 }
 0x5c5   :  { %v277_v17 = vadd.s32 %v276_v14, %v274_v16 }
 0x5c6   :  { %v356_v20 = vpop.xlane.xlu1 %355 }
 0x5c7   :  { %vm278_vm15 = vcmp.eq.s32.totalorder %v1385_v54, %v277_v17  ;;  %v357_v22 = vcvt.f32.s32 %v356_v20  ;;  %v326_v23 = vsel %vm321_vm14, %v277_v17, %v325_v19 }
 0x5c8   :  { %v1476_v24 = vsel %vm278_vm15, 1.0, %v2065_v37 }
 0x5c9   :  { %v360_v25 = vadd.s32 %v359_v21, %v357_v22  ;;  %v289_v26 = vmul.f32 %v1476_v24, %v1441_v43 }
 0x5cb   :  { %v290_v27 = vsel %vm257_vm8, %v289_v26, 0.0  ;;  %vm361_vm3 = vcmp.eq.s32.totalorder %v1385_v54, %v360_v25  ;;  %v1485_v28 = vsel %vm440_vm0, %v360_v25, %v326_v23 }
 0x5cc   :  { %291 = vadd.xlane.f32.xlu0 %v290_v27  ;;  %v1155_v29 = vsel %vm361_vm3, 1.0, %v2065_v37 }
 0x5cd   :  { %v372_v30 = vmul.f32 %v1155_v29, %v1428_v3  ;;  %v415_v31 = vadd.f32 %v1155_v29, %v1425_v38 }
 0x5cf   :  { %v373_v32 = vsel %vm148_vm2, %v372_v30, 0.0  ;;  %vm447_vm4 = vcmp.gt.f32.partialorder %v415_v31, 0.5 }
 0x5d0   :  { %374 = vadd.xlane.f32.xlu1 %v373_v32  ;;  %v1492_v33 = vsel %vm447_vm4, -1e+09, %v1401_v63 }
 0x5d1   :  { %v449_v34 = vsel %vm148_vm2, %v1492_v33, -inf }
 0x5d4   :  { %450 = vmax.xlane.f32.xlu1 %v449_v34 }
 0x659   :  { %v292_v0 = vpop.xlane.xlu0 %291 }
 0x65a   :  { %v1497_v35 = vmul.f32 %v292_v0, %v1447_v45 }
 0x65c   :  { %2098 = vst [vmem:[#allocation9_spill] sm:$0xff] %v1497_v35  ;;  %v1503_v38 = vmul.f32 %v1476_v24, %v1497_v35 }
 0x65d   :  { %v1499_v36 = vpop.xlane.xlu1 %374 }
 0x65e   :  { %v376_v39 = vmul.f32 %v1499_v36, %v1441_v43 }
 0x660   :  { %v377_v40 = vadd.f32 %v376_v39, %v1503_v38 }
 0x661   :  { %v1508_v42 = vpop.xlane.xlu1 %450 }
 0x662   :  { %vm452_vm5 = vcmp.ge.f32.partialorder %v1492_v33, %v1508_v42  ;;  %v1513_v46 = vsub.f32 %v1445_v44, %v377_v40 }
 0x663   :  { %v453_v45 = vsel %vm452_vm5, %v1385_v54, 8 }
 0x664   :  { %v379_v48 = vsel %vm257_vm8, %v1513_v46, -inf  ;;  %v454_v8 = vsel %vm148_vm2, %v453_v45, 2147483647 }
 0x665   :  { %380 = vmax.xlane.f32.xlu0 %v379_v48  ;;  %v456_v18 = vshra.s32 %v454_v8, 16  ;;  %v455_v52 = vand.u32 65535, %v454_v8 }
 0x667   :  { %v458_v50 = vcvt.s32.f32 %v456_v18  ;;  %v457_v59 = vcvt.s32.f32 %v455_v52 }
 0x669   :  { %459 = vmin.xlane.f32.xlu1 %v458_v50 }
 0x6f2   :  { %v1519_v51 = vpop.xlane.xlu0 %380 }
 0x6f3   :  { %vm382_vm6 = vcmp.ge.f32.partialorder %v1513_v46, %v1519_v51 }
 0x6f4   :  { %v383_v53 = vsel %vm382_vm6, %v1385_v54, 16 }
 0x6f5   :  { %v384_v55 = vsel %vm257_vm8, %v383_v53, 2147483647 }
 0x6f6   :  { %v460_v57 = vpop.xlane.xlu1 %459  ;;  %v386_v61 = vshra.s32 %v384_v55, 16  ;;  %v385_v6 = vand.u32 65535, %v384_v55 }
 0x6f7   :  { %vm461_vm7 = vcmp.eq.f32.partialorder %v458_v50, %v460_v57  ;;  %v466_v2 = vcvt.f32.s32 %v460_v57 }
 0x6f8   :  { %v462_v62 = vsel %vm461_vm7, %v457_v59, inf  ;;  %v388_v1 = vcvt.s32.f32 %v386_v61  ;;  %v387_v14 = vcvt.s32.f32 %v385_v6 }
 0x6f9   :  { %463 = vmin.xlane.f32.xlu1 %v462_v62  ;;  %v467_v10 = vshll.u32 %v466_v2, 16 }
 0x6fa   :  { %389 = vmin.xlane.f32.xlu0 %v388_v1 }
 0x786   :  { %v464_v7 = vpop.xlane.xlu1 %463 }
 0x787   :  { %v465_v11 = vcvt.f32.s32 %v464_v7  ;;  %v390_v12 = vpop.xlane.xlu0 %389 }
 0x788   :  { %vm391_vm9 = vcmp.eq.f32.partialorder %v388_v1, %v390_v12  ;;  %v396_v25 = vcvt.f32.s32 %v390_v12 }
 0x789   :  { %v1525_v15 = vadd.s32 %v467_v10, %v465_v11  ;;  %v392_v16 = vsel %vm391_vm9, %v387_v14, inf }
 0x78a   :  { %393 = vmin.xlane.f32.xlu0 %v392_v16  ;;  %v397_v27 = vshll.u32 %v396_v25, 16 }
 0x78b   :  { %vm469_vm10 = vcmp.eq.s32.totalorder %v1385_v54, %v1525_v15 }
 0x78c   :  { %v1157_v17 = vsel %vm469_vm10, 1.0, %v2065_v37 }
 0x78d   :  { %v480_v19 = vmul.f32 %v1157_v17, %v1428_v3  ;;  %v523_v20 = vadd.f32 %v1157_v17, %v415_v31 }
 0x78f   :  { %v481_v21 = vsel %vm148_vm2, %v480_v19, 0.0  ;;  %vm555_vm11 = vcmp.gt.f32.partialorder %v523_v20, 0.5 }
 0x790   :  { %482 = vadd.xlane.f32.xlu1 %v481_v21  ;;  %v1533_v22 = vsel %vm555_vm11, -1e+09, %v1401_v63  ;;  %vm548_vm11 = vcmp.eq.s32.totalorder %v1385_v54, 2 }
 0x791   :  { %v557_v23 = vsel %vm148_vm2, %v1533_v22, -inf }
 0x794   :  { %558 = vmax.xlane.f32.xlu1 %v557_v23 }
 0x817   :  { %v394_v26 = vpop.xlane.xlu0 %393 }
 0x818   :  { %v395_v29 = vcvt.f32.s32 %v394_v26 }
 0x81a   :  { %v398_v30 = vadd.s32 %v397_v27, %v395_v29 }
 0x81c   :  { %vm399_vm15 = vcmp.eq.s32.totalorder %v1385_v54, %v398_v30  ;;  %v1542_v31 = vsel %vm441_vm12, %v398_v30, %v1485_v28 }
 0x81d   :  { %v1545_v32 = vsel %vm399_vm15, 1.0, %v2065_v37  ;;  %v1547_v34 = vpop.xlane.xlu1 %482  ;;  %vm549_vm15 = vcmp.eq.s32.totalorder %v1385_v54, 10 }
 0x81e   :  { %2099 = vst [vmem:[#allocation10_spill] sm:$0xff] %v1545_v32  ;;  %v410_v0 = vmul.f32 %v1545_v32, %v1441_v43  ;;  %v484_v55 = vmul.f32 %v1547_v34, %v1441_v43 }
 0x820   :  { %v411_v39 = vsel %vm257_vm8, %v410_v0, 0.0 }
 0x821   :  { %412 = vadd.xlane.f32.xlu0 %v411_v39  ;;  %v1552_v40 = vpop.xlane.xlu1 %558 }
 0x822   :  { %vm560_vm3 = vcmp.ge.f32.partialorder %v1533_v22, %v1552_v40 }
 0x823   :  { %v561_v45 = vsel %vm560_vm3, %v1385_v54, 8 }
 0x824   :  { %v562_v28 = vsel %vm148_vm2, %v561_v45, 2147483647 }
 0x825   :  { %v564_v48 = vshra.s32 %v562_v28, 16  ;;  %v563_v53 = vand.u32 65535, %v562_v28 }
 0x827   :  { %v566_v8 = vcvt.s32.f32 %v564_v48  ;;  %v565_v62 = vcvt.s32.f32 %v563_v53 }
 0x829   :  { %567 = vmin.xlane.f32.xlu1 %v566_v8 }
 0x8ae   :  { %v413_v18 = vpop.xlane.xlu0 %412 }
 0x8af   :  { %v1559_v50 = vmul.f32 %v413_v18, %v1499_v36 }
 0x8b1   :  { %2100 = vst [vmem:[#allocation11_spill] sm:$0xff] %v1559_v50  ;;  %v416_v52 = vmul.f32 %v1545_v32, %v1559_v50 }
 0x8b3   :  { %v1566_v57 = vadd.f32 %v416_v52, %v1503_v38 }
 0x8b5   :  { %v485_v59 = vadd.f32 %v484_v55, %v1566_v57 }
 0x8b6   :  { %v568_v61 = vpop.xlane.xlu1 %567 }
 0x8b7   :  { %vm569_vm4 = vcmp.eq.f32.partialorder %v566_v8, %v568_v61  ;;  %v1570_v1 = vsub.f32 %v1445_v44, %v485_v59  ;;  %v574_v6 = vcvt.f32.s32 %v568_v61 }
 0x8b8   :  { %v570_v36 = vsel %vm569_vm4, %v565_v62, inf }
 0x8b9   :  { %571 = vmin.xlane.f32.xlu1 %v570_v36  ;;  %v487_v2 = vsel %vm257_vm8, %v1570_v1, -inf  ;;  %v575_v10 = vshll.u32 %v574_v6, 16  ;;  %v553_v36 = vsel %vm548_vm11, %v1525_v15, %v1542_v31 }
 0x8ba   :  { %488 = vmax.xlane.f32.xlu0 %v487_v2 }
 0x946   :  { %v572_v7 = vpop.xlane.xlu1 %571 }
 0x947   :  { %v573_v11 = vcvt.f32.s32 %v572_v7  ;;  %v1574_v38 = vpop.xlane.xlu0 %488 }
 0x948   :  { %vm490_vm5 = vcmp.ge.f32.partialorder %v1570_v1, %v1574_v38 }
 0x949   :  { %v1578_v12 = vadd.s32 %v575_v10, %v573_v11  ;;  %v491_v14 = vsel %vm490_vm5, %v1385_v54, 16 }
 0x94a   :  { %v492_v16 = vsel %vm257_vm8, %v491_v14, 2147483647 }
 0x94b   :  { %v494_v17 = vshra.s32 %v492_v16, 16  ;;  %vm577_vm6 = vcmp.eq.s32.totalorder %v1385_v54, %v1578_v12  ;;  %v493_v30 = vand.u32 65535, %v492_v16 }
 0x94c   :  { %v1159_v19 = vsel %vm577_vm6, 1.0, %v2065_v37 }
 0x94d   :  { %v496_v21 = vcvt.s32.f32 %v494_v17  ;;  %v588_v23 = vmul.f32 %v1159_v19, %v1428_v3  ;;  %v631_v25 = vadd.f32 %v1159_v19, %v523_v20  ;;  %v495_v39 = vcvt.s32.f32 %v493_v30 }
 0x94f   :  { %497 = vmin.xlane.f32.xlu0 %v496_v21  ;;  %v589_v26 = vsel %vm148_vm2, %v588_v23, 0.0  ;;  %vm663_vm7 = vcmp.gt.f32.partialorder %v631_v25, 0.5 }
 0x950   :  { %590 = vadd.xlane.f32.xlu1 %v589_v26  ;;  %v1588_v27 = vsel %vm663_vm7, -1e+09, %v1401_v63 }
 0x951   :  { %v665_v29 = vsel %vm148_vm2, %v1588_v27, -inf }
 0x954   :  { %666 = vmax.xlane.f32.xlu1 %v665_v29 }
 0x9dc   :  { %v498_v0 = vpop.xlane.xlu0 %497 }
 0x9dd   :  { %v1592_v45 = vpop.xlane.xlu1 %590  ;;  %vm499_vm9 = vcmp.eq.f32.partialorder %v496_v21, %v498_v0  ;;  %v504_v53 = vcvt.f32.s32 %v498_v0 }
 0x9de   :  { %v500_v28 = vsel %vm499_vm9, %v495_v39, inf  ;;  %v592_v30 = vmul.f32 %v1592_v45, %v1441_v43 }
 0x9df   :  { %501 = vmin.xlane.f32.xlu0 %v500_v28  ;;  %v505_v59 = vshll.u32 %v504_v53, 16 }
 0x9e1   :  { %v1594_v20 = vpop.xlane.xlu1 %666 }
 0x9e2   :  { %vm668_vm10 = vcmp.ge.f32.partialorder %v1588_v27, %v1594_v20 }
 0x9e3   :  { %v669_v48 = vsel %vm668_vm10, %v1385_v54, 8 }
 0x9e4   :  { %v670_v8 = vsel %vm148_vm2, %v669_v48, 2147483647 }
 0x9e5   :  { %v672_v18 = vshra.s32 %v670_v8, 16  ;;  %v671_v7 = vand.u32 65535, %v670_v8 }
 0x9e7   :  { %v674_v52 = vcvt.s32.f32 %v672_v18  ;;  %v673_v16 = vcvt.s32.f32 %v671_v7 }
 0x9e9   :  { %675 = vmin.xlane.f32.xlu1 %v674_v52 }
 0xa6c   :  { %v502_v55 = vpop.xlane.xlu0 %501 }
 0xa6d   :  { %v503_v61 = vcvt.f32.s32 %v502_v55 }
 0xa6f   :  { %v506_v62 = vadd.s32 %v505_v59, %v503_v61 }
 0xa71   :  { %vm507_vm3 = vcmp.eq.s32.totalorder %v1385_v54, %v506_v62  ;;  %v1609_v2 = vsel %vm549_vm15, %v506_v62, %v553_v36 }
 0xa72   :  { %v1612_v6 = vsel %vm507_vm3, 1.0, %v2065_v37 }
 0xa73   :  { %v518_v10 = vmul.f32 %v1612_v6, %v1441_v43 }
 0xa75   :  { %v519_v11 = vsel %vm257_vm8, %v518_v10, 0.0 }
 0xa76   :  { %520 = vadd.xlane.f32.xlu0 %v519_v11  ;;  %v676_v14 = vpop.xlane.xlu1 %675 }
 0xa77   :  { %vm677_vm4 = vcmp.eq.f32.partialorder %v674_v52, %v676_v14  ;;  %v682_v31 = vcvt.f32.s32 %v676_v14 }
 0xa78   :  { %v678_v15 = vsel %vm677_vm4, %v673_v16, inf  ;;  %vm656_vm4 = vcmp.eq.s32.totalorder %v1385_v54, 3 }
 0xa79   :  { %679 = vmin.xlane.f32.xlu1 %v678_v15  ;;  %v683_v26 = vshll.u32 %v682_v31, 16 }
 0xb03   :  { %v521_v17 = vpop.xlane.xlu0 %520 }
 0xb04   :  { %v1618_v19 = vmul.f32 %v521_v17, %v1547_v34 }
 0xb06   :  { %2101 = vst [vmem:[#allocation12_spill] sm:$0xff] %v1618_v19  ;;  %v524_v21 = vmul.f32 %v1612_v6, %v1618_v19  ;;  %v680_v23 = vpop.xlane.xlu1 %679 }
 0xb07   :  { %v681_v29 = vcvt.f32.s32 %v680_v23 }
 0xb08   :  { %v1625_v0 = vadd.f32 %v524_v21, %v1566_v57 }
 0xb09   :  { %v1627_v39 = vadd.s32 %v683_v26, %v681_v29 }
 0xb0a   :  { %v593_v28 = vadd.f32 %v592_v30, %v1625_v0 }
 0xb0b   :  { %vm685_vm5 = vcmp.eq.s32.totalorder %v1385_v54, %v1627_v39 }
 0xb0c   :  { %v1633_v34 = vsub.f32 %v1445_v44, %v593_v28  ;;  %v1161_v48 = vsel %vm685_vm5, 1.0, %v2065_v37  ;;  %vm657_vm5 = vcmp.eq.s32.totalorder %v1385_v54, 11 }
 0xb0d   :  { %v696_v8 = vmul.f32 %v1161_v48, %v1428_v3  ;;  %v739_v18 = vadd.f32 %v1161_v48, %v631_v25 }
 0xb0e   :  { %v595_v52 = vsel %vm257_vm8, %v1633_v34, -inf }
 0xb0f   :  { %596 = vmax.xlane.f32.xlu0 %v595_v52  ;;  %v697_v57 = vsel %vm148_vm2, %v696_v8, 0.0  ;;  %vm771_vm6 = vcmp.gt.f32.partialorder %v739_v18, 0.5 }
 0xb10   :  { %698 = vadd.xlane.f32.xlu1 %v697_v57  ;;  %v1641_v53 = vsel %vm771_vm6, -1e+09, %v1401_v63 }
 0xb11   :  { %2102 = vst [vmem:[#allocation13_spill] sm:$0xff] %v1641_v53  ;;  %v773_v55 = vsel %vm148_vm2, %v1641_v53, -inf }
 0xb14   :  { %774 = vmax.xlane.f32.xlu1 %v773_v55 }
 0xb9c   :  { %v1645_v59 = vpop.xlane.xlu0 %596 }
 0xb9d   :  { %vm598_vm7 = vcmp.ge.f32.partialorder %v1633_v34, %v1645_v59  ;;  %v1649_v25 = vpop.xlane.xlu1 %698 }
 0xb9e   :  { %v599_v61 = vsel %vm598_vm7, %v1385_v54, 16 }
 0xb9f   :  { %v600_v62 = vsel %vm257_vm8, %v599_v61, 2147483647 }
 0xba0   :  { %v602_v36 = vshra.s32 %v600_v62, 16  ;;  %v601_v31 = vand.u32 65535, %v600_v62  ;;  %v661_v62 = vsel %vm656_vm4, %v1578_v12, %v1609_v2 }
 0xba1   :  { %v1653_v7 = vpop.xlane.xlu1 %774 }
 0xba2   :  { %2103 = vst [vmem:[#allocation14_spill] sm:$0xff] %v1653_v7  ;;  %vm776_vm9 = vcmp.ge.f32.partialorder %v1641_v53, %v1653_v7  ;;  %v604_v10 = vcvt.s32.f32 %v602_v36  ;;  %v603_v21 = vcvt.s32.f32 %v601_v31 }
 0xba3   :  { %v777_v11 = vsel %vm776_vm9, %v1385_v54, 8 }
 0xba4   :  { %605 = vmin.xlane.f32.xlu0 %v604_v10  ;;  %v778_v14 = vsel %vm148_vm2, %v777_v11, 2147483647 }
 0xba5   :  { %v780_v16 = vshra.s32 %v778_v14, 16  ;;  %v779_v23 = vand.u32 65535, %v778_v14 }
 0xba7   :  { %v782_v15 = vcvt.s32.f32 %v780_v16  ;;  %v781_v30 = vcvt.s32.f32 %v779_v23 }
 0xba9   :  { %783 = vmin.xlane.f32.xlu1 %v782_v15 }
 0xc31   :  { %v606_v17 = vpop.xlane.xlu0 %605 }
 0xc32   :  { %vm607_vm10 = vcmp.eq.f32.partialorder %v604_v10, %v606_v17  ;;  %v612_v48 = vcvt.f32.s32 %v606_v17 }
 0xc33   :  { %v608_v26 = vsel %vm607_vm10, %v603_v21, inf }
 0xc34   :  { %609 = vmin.xlane.f32.xlu0 %v608_v26  ;;  %v613_v52 = vshll.u32 %v612_v48, 16 }
 0xc36   :  { %v784_v29 = vpop.xlane.xlu1 %783 }
 0xc37   :  { %vm785_vm3 = vcmp.eq.f32.partialorder %v782_v15, %v784_v29  ;;  %v790_v55 = vcvt.f32.s32 %v784_v29 }
 0xc38   :  { %v786_v28 = vsel %vm785_vm3, %v781_v30, inf }
 0xc39   :  { %787 = vmin.xlane.f32.xlu1 %v786_v28  ;;  %v791_v11 = vshll.u32 %v790_v55, 16 }
 0xcc1   :  { %v610_v8 = vpop.xlane.xlu0 %609 }
 0xcc2   :  { %v611_v57 = vcvt.f32.s32 %v610_v8 }
 0xcc4   :  { %v614_v61 = vadd.s32 %v613_v52, %v611_v57 }
 0xcc6   :  { %vm615_vm6 = vcmp.eq.s32.totalorder %v1385_v54, %v614_v61  ;;  %v788_v36 = vpop.xlane.xlu1 %787  ;;  %v1668_v10 = vsel %vm657_vm5, %v614_v61, %v661_v62 }
 0xcc7   :  { %v1671_v14 = vsel %vm615_vm6, 1.0, %v2065_v37  ;;  %v789_v16 = vcvt.f32.s32 %v788_v36 }
 0xcc8   :  { %2104 = vst [vmem:[#allocation15_spill] sm:$0xff] %v1671_v14  ;;  %v626_v15 = vmul.f32 %v1671_v14, %v1441_v43 }
 0xcc9   :  { %v1675_v31 = vadd.s32 %v791_v11, %v789_v16 }
 0xcca   :  { %v627_v17 = vsel %vm257_vm8, %v626_v15, 0.0 }
 0xccb   :  { %628 = vadd.xlane.f32.xlu0 %v627_v17  ;;  %vm793_vm7 = vcmp.eq.s32.totalorder %v1385_v54, %v1675_v31 }
 0xccc   :  { %v1163_v12 = vsel %vm793_vm7, 1.0, %v2065_v37 }
 0xccd   :  { %v804_v2 = vmul.f32 %v1163_v12, %v1428_v3  ;;  %v847_v21 = vadd.f32 %v1163_v12, %v739_v18  ;;  %v700_v18 = vmul.f32 %v1649_v25, %v1441_v43 }
 0xccf   :  { %v805_v23 = vsel %vm148_vm2, %v804_v2, 0.0  ;;  %vm879_vm9 = vcmp.gt.f32.partialorder %v847_v21, 0.5 }
 0xcd0   :  { %806 = vadd.xlane.f32.xlu1 %v805_v23  ;;  %v1684_v26 = vsel %vm879_vm9, -1e+09, %v1401_v63 }
 0xcd1   :  { %2105 = vst [vmem:[#allocation16_spill] sm:$0xff] %v1684_v26  ;;  %v881_v29 = vsel %vm148_vm2, %v1684_v26, -inf }
 0xcd4   :  { %882 = vmax.xlane.f32.xlu1 %v881_v29 }
 0xd58   :  { %v629_v30 = vpop.xlane.xlu0 %628 }
 0xd59   :  { %v1689_v28 = vmul.f32 %v629_v30, %v1592_v45 }
 0xd5b   :  { %2106 = vst [vmem:[#allocation17_spill] sm:$0xff] %v1689_v28  ;;  %v632_v48 = vmul.f32 %v1671_v14, %v1689_v28 }
 0xd5d   :  { %v1696_v8 = vadd.f32 %v632_v48, %v1625_v0  ;;  %v1698_v52 = vpop.xlane.xlu1 %806 }
 0xd5f   :  { %v701_v57 = vadd.f32 %v700_v18, %v1696_v8 }
 0xd61   :  { %v1701_v55 = vpop.xlane.xlu1 %882  ;;  %v1704_v61 = vsub.f32 %v1445_v44, %v701_v57 }
 0xd62   :  { %2107 = vst [vmem:[#allocation18_spill] sm:$0xff] %v1701_v55  ;;  %vm884_vm10 = vcmp.ge.f32.partialorder %v1684_v26, %v1701_v55 }
 0xd63   :  { %v885_v45 = vsel %vm884_vm10, %v1385_v54, 8  ;;  %v703_v62 = vsel %vm257_vm8, %v1704_v61, -inf }
 0xd64   :  { %704 = vmax.xlane.f32.xlu0 %v703_v62  ;;  %v886_v0 = vsel %vm148_vm2, %v885_v45, 2147483647 }
 0xd65   :  { %v888_v36 = vshra.s32 %v886_v0, 16  ;;  %v887_v15 = vand.u32 65535, %v886_v0 }
 0xd67   :  { %v890_v11 = vcvt.s32.f32 %v888_v36  ;;  %v889_v29 = vcvt.s32.f32 %v887_v15  ;;  %v2108_v15 = vmov 0.0  }
 0xd69   :  { %891 = vmin.xlane.f32.xlu1 %v890_v11 }
 0xdf1   :  { %v1712_v16 = vpop.xlane.xlu0 %704 }
 0xdf2   :  { %vm706_vm3 = vcmp.ge.f32.partialorder %v1704_v61, %v1712_v16 }
 0xdf3   :  { %v707_v17 = vsel %vm706_vm3, %v1385_v54, 16  ;;  %vm2075_vm3 = vcmp.eq.s32.totalorder %v1385_v54, 4 }
 0xdf4   :  { %v708_v12 = vsel %vm257_vm8, %v707_v17, 2147483647 }
 0xdf5   :  { %v710_v2 = vshra.s32 %v708_v12, 16  ;;  %v709_v18 = vand.u32 65535, %v708_v12 }
 0xdf6   :  { %v892_v23 = vpop.xlane.xlu1 %891 }
 0xdf7   :  { %v712_v30 = vcvt.s32.f32 %v710_v2  ;;  %vm893_vm6 = vcmp.eq.f32.partialorder %v890_v11, %v892_v23  ;;  %v898_v57 = vcvt.f32.s32 %v892_v23  ;;  %v711_v36 = vcvt.s32.f32 %v709_v18 }
 0xdf8   :  { %v894_v48 = vsel %vm893_vm6, %v889_v29, inf  ;;  %vm765_vm6 = vcmp.eq.s32.totalorder %v1385_v54, 12  ;;  %v769_v18 = vsel %vm2075_vm3, %v1627_v39, %v1668_v10 }
 0xdf9   :  { %713 = vmin.xlane.f32.xlu0 %v712_v30  ;;  %895 = vmin.xlane.f32.xlu1 %v894_v48  ;;  %v899_v37 = vshll.u32 %v898_v57, 16 }
 0xe86   :  { %v714_v45 = vpop.xlane.xlu0 %713  ;;  %v896_v62 = vpop.xlane.xlu1 %895 }
 0xe87   :  { %v897_v28 = vcvt.f32.s32 %v896_v62  ;;  %vm715_vm7 = vcmp.eq.f32.partialorder %v712_v30, %v714_v45 }
 0xe88   :  { %v716_v0 = vsel %vm715_vm7, %v711_v36, inf }
 0xe89   :  { %v1718_v19 = vadd.s32 %v899_v37, %v897_v28  ;;  %717 = vmin.xlane.f32.xlu0 %v716_v0  ;;  %v720_v28 = vcvt.f32.s32 %v714_v45 }
 0xe8b   :  { %vm901_vm9 = vcmp.eq.s32.totalorder %v1385_v54, %v1718_v19  ;;  %v721_v30 = vshll.u32 %v720_v28, 16  ;;  %v808_v28 = vmul.f32 %v1698_v52, %v1441_v43 }
 0xe8c   :  { %v1165_v11 = vsel %vm901_vm9, 1.0, %v2108_v15 }
 0xe8d   :  { %v912_v17 = vmul.f32 %v1165_v11, %v1428_v3  ;;  %v955_v2 = vadd.f32 %v1165_v11, %v847_v21 }
 0xe8f   :  { %v913_v12 = vsel %vm148_vm2, %v912_v17, 0.0  ;;  %vm987_vm10 = vcmp.gt.f32.partialorder %v955_v2, 0.5 }
 0xe90   :  { %914 = vadd.xlane.f32.xlu1 %v913_v12  ;;  %v1726_v23 = vsel %vm987_vm10, -1e+09, %v1401_v63 }
 0xe91   :  { %v989_v37 = vsel %vm148_vm2, %v1726_v23, -inf }
 0xe94   :  { %990 = vmax.xlane.f32.xlu1 %v989_v37 }
 0xf16   :  { %v718_v29 = vpop.xlane.xlu0 %717 }
 0xf17   :  { %v719_v48 = vcvt.f32.s32 %v718_v29 }
 0xf19   :  { %v722_v21 = vadd.s32 %v721_v30, %v719_v48 }
 0xf1b   :  { %vm723_vm7 = vcmp.eq.s32.totalorder %v1385_v54, %v722_v21  ;;  %v770_v63 = vsel %vm765_vm6, %v722_v21, %v769_v18 }
 0xf1c   :  { %v1740_v57 = vsel %vm723_vm7, 1.0, %v2108_v15 }
 0xf1d   :  { %v1742_v45 = vpop.xlane.xlu1 %914  ;;  %v734_v62 = vmul.f32 %v1740_v57, %v1441_v43 }
 0xf1f   :  { %v735_v36 = vsel %vm257_vm8, %v734_v62, 0.0 }
 0xf20   :  { %736 = vadd.xlane.f32.xlu0 %v735_v36 }
 0xf21   :  { %v1747_v0 = vpop.xlane.xlu1 %990 }
 0xf22   :  { %vm992_vm9 = vcmp.ge.f32.partialorder %v1726_v23, %v1747_v0 }
 0xf23   :  { %v993_v39 = vsel %vm992_vm9, %v1385_v54, 8 }
 0xf24   :  { %v994_v10 = vsel %vm148_vm2, %v993_v39, 2147483647 }
 0xf25   :  { %v996_v11 = vshra.s32 %v994_v10, 16  ;;  %v995_v30 = vand.u32 65535, %v994_v10 }
 0xf27   :  { %v998_v17 = vcvt.s32.f32 %v996_v11  ;;  %v997_v62 = vcvt.s32.f32 %v995_v30 }
 0xf29   :  { %999 = vmin.xlane.f32.xlu1 %v998_v17 }
 0xfad   :  { %v737_v2 = vpop.xlane.xlu0 %736 }
 0xfae   :  { %v1754_v12 = vmul.f32 %v737_v2, %v1649_v25 }
 0xfb0   :  { %2109 = vst [vmem:[#allocation19_spill] sm:$0xff] %v1754_v12  ;;  %v740_v37 = vmul.f32 %v1740_v57, %v1754_v12 }
 0xfb2   :  { %v741_v29 = vadd.f32 %v740_v37, %v1696_v8 }
 0xfb4   :  { %v809_v48 = vadd.f32 %v808_v28, %v741_v29 }
 0xfb6   :  { %v1000_v21 = vpop.xlane.xlu1 %999  ;;  %v1762_v18 = vsub.f32 %v1445_v44, %v809_v48 }
 0xfb7   :  { %vm1001_vm10 = vcmp.eq.f32.partialorder %v998_v17, %v1000_v21  ;;  %v1006_v39 = vcvt.f32.s32 %v1000_v21 }
 0xfb8   :  { %2110 = vst [vmem:[#allocation20_spill] sm:$0xff] %v1762_v18  ;;  %v811_v25 = vsel %vm257_vm8, %v1762_v18, -inf  ;;  %v1002_v36 = vsel %vm1001_vm10, %v997_v62, inf }
 0xfb9   :  { %812 = vmax.xlane.f32.xlu0 %v811_v25  ;;  %1003 = vmin.xlane.f32.xlu1 %v1002_v36  ;;  %v1007_v12 = vshll.u32 %v1006_v39, 16 }
0x1046   :  { %v1766_v11 = vpop.xlane.xlu0 %812  ;;  %v1004_v2 = vpop.xlane.xlu1 %1003 }
0x1047   :  { %vm814_vm7 = vcmp.ge.f32.partialorder %v1762_v18, %v1766_v11  ;;  %v1005_v8 = vcvt.f32.s32 %v1004_v2 }
0x1048   :  { %v815_v10 = vsel %vm814_vm7, %v1385_v54, 16  ;;  %vm2076_vm7 = vcmp.eq.s32.totalorder %v1385_v54, 5 }
0x1049   :  { %v1771_v37 = vadd.s32 %v1007_v12, %v1005_v8  ;;  %v816_v17 = vsel %vm257_vm8, %v815_v10, 2147483647 }
0x104a   :  { %v818_v28 = vshra.s32 %v816_v17, 16  ;;  %v817_v25 = vand.u32 65535, %v816_v17 }
0x104b   :  { %vm1009_vm9 = vcmp.eq.s32.totalorder %v1385_v54, %v1771_v37 }
0x104c   :  { %v820_v30 = vcvt.s32.f32 %v818_v28  ;;  %v1167_v48 = vsel %vm1009_vm9, 1.0, %v2108_v15  ;;  %v819_v39 = vcvt.s32.f32 %v817_v25  ;;  %vm2077_vm9 = vcmp.eq.s32.totalorder %v1385_v54, 13 }
0x104d   :  { %v1020_v21 = vmul.f32 %v1167_v48, %v1428_v3  ;;  %v877_v3 = vsel %vm2076_vm7, %v1675_v31, %v770_v63  ;;  %v916_v63 = vmul.f32 %v1742_v45, %v1441_v43  ;;  %vm2096_vm7 = vcmp.eq.s32.totalorder %v1385_v54, 6 }
0x104e   :  { %821 = vmin.xlane.f32.xlu0 %v820_v30 }
0x104f   :  { %v1021_v62 = vsel %vm148_vm2, %v1020_v21, 0.0 }
0x1050   :  { %1022 = vadd.xlane.f32.xlu1 %v1021_v62 }
0x10db   :  { %v822_v36 = vpop.xlane.xlu0 %821 }
0x10dc   :  { %vm823_vm10 = vcmp.eq.f32.partialorder %v820_v30, %v822_v36  ;;  %v828_v2 = vcvt.f32.s32 %v822_v36 }
0x10dd   :  { %v824_v12 = vsel %vm823_vm10, %v819_v39, inf }
0x10de   :  { %825 = vmin.xlane.f32.xlu0 %v824_v12  ;;  %v829_v10 = vshll.u32 %v828_v2, 16 }
0x116b   :  { %v826_v8 = vpop.xlane.xlu0 %825 }
0x116c   :  { %v827_v35 = vcvt.f32.s32 %v826_v8 }
0x116e   :  { %v830_v28 = vadd.s32 %v829_v10, %v827_v35 }
0x1170   :  { %vm831_vm3 = vcmp.eq.s32.totalorder %v1385_v54, %v830_v28  ;;  %v878_v17 = vsel %vm2077_vm9, %v830_v28, %v877_v3  ;;  %vm981_vm9 = vcmp.eq.s32.totalorder %v1385_v54, 14 }
0x1171   :  { %v1788_v30 = vsel %vm831_vm3, 1.0, %v2108_v15 }
0x1172   :  { %v842_v48 = vmul.f32 %v1788_v30, %v1441_v43 }
0x1174   :  { %v843_v21 = vsel %vm257_vm8, %v842_v48, 0.0 }
0x1175   :  { %844 = vadd.xlane.f32.xlu0 %v843_v21 }
0x1202   :  { %v845_v62 = vpop.xlane.xlu0 %844 }
0x1203   :  { %v1794_v35 = vmul.f32 %v845_v62, %v1698_v52 }
0x1205   :  { %2111 = vst [vmem:[#allocation21_spill] sm:$0xff] %v1794_v35  ;;  %v848_v31 = vmul.f32 %v1788_v30, %v1794_v35 }
0x1207   :  { %v849_v25 = vadd.f32 %v848_v31, %v741_v29 }
0x1209   :  { %v917_v36 = vadd.f32 %v916_v63, %v849_v25 }
0x120b   :  { %v1801_v39 = vsub.f32 %v1445_v44, %v917_v36 }
0x120d   :  { %2112 = vst [vmem:[#allocation22_spill] sm:$0xff] %v1801_v39  ;;  %v919_v12 = vsel %vm257_vm8, %v1801_v39, -inf }
0x120e   :  { %920 = vmax.xlane.f32.xlu0 %v919_v12 }
0x129b   :  { %v1805_v2 = vpop.xlane.xlu0 %920 }
0x129c   :  { %2113 = vst [vmem:[#allocation23_spill] sm:$0xff] %v1805_v2  ;;  %vm922_vm3 = vcmp.ge.f32.partialorder %v1801_v39, %v1805_v2 }
0x129d   :  { %v923_v52 = vsel %vm922_vm3, %v1385_v54, 16 }
0x129e   :  { %v924_v8 = vsel %vm257_vm8, %v923_v52, 2147483647  ;;  %v985_v52 = vsel %vm2096_vm7, %v1718_v19, %v878_v17  ;;  %v1830_v19 = vpop.xlane.xlu1 %1022 }
0x129f   :  { %v926_v10 = vshra.s32 %v924_v8, 16  ;;  %v925_v29 = vand.u32 65535, %v924_v8  ;;  %2116 = vst [vmem:[#allocation26_spill] sm:$0xff] %v1830_v19 }
0x12a1   :  { %v928_v28 = vcvt.s32.f32 %v926_v10  ;;  %v927_v48 = vcvt.s32.f32 %v925_v29 }
0x12a3   :  { %929 = vmin.xlane.f32.xlu0 %v928_v28 }
0x1330   :  { %v930_v3 = vpop.xlane.xlu0 %929 }
0x1331   :  { %vm931_vm10 = vcmp.eq.f32.partialorder %v928_v28, %v930_v3  ;;  %v936_v62 = vcvt.f32.s32 %v930_v3 }
0x1332   :  { %v932_v21 = vsel %vm931_vm10, %v927_v48, inf }
0x1333   :  { %933 = vmin.xlane.f32.xlu0 %v932_v21  ;;  %v937_v63 = vshll.u32 %v936_v62, 16  ;;  %v1024_v21 = vmul.f32 %v1830_v19, %v1441_v43 }
0x13c0   :  { %v934_v31 = vpop.xlane.xlu0 %933 }
0x13c1   :  { %v935_v36 = vcvt.f32.s32 %v934_v31 }
0x13c3   :  { %v938_v12 = vadd.s32 %v937_v63, %v935_v36 }
0x13c5   :  { %vm939_vm3 = vcmp.eq.s32.totalorder %v1385_v54, %v938_v12  ;;  %v1819_v8 = vsel %vm981_vm9, %v938_v12, %v985_v52 }
0x13c6   :  { %v1822_v10 = vsel %vm939_vm3, 1.0, %v2108_v15 }
0x13c7   :  { %2114 = vst [vmem:[#allocation24_spill] sm:$0xff] %v1822_v10  ;;  %v950_v28 = vmul.f32 %v1822_v10, %v1441_v43 }
0x13c9   :  { %v951_v29 = vsel %vm257_vm8, %v950_v28, 0.0 }
0x13ca   :  { %952 = vadd.xlane.f32.xlu0 %v951_v29 }
0x1457   :  { %v953_v3 = vpop.xlane.xlu0 %952 }
0x1458   :  { %v1828_v48 = vmul.f32 %v953_v3, %v1742_v45 }
0x145a   :  { %2115 = vst [vmem:[#allocation25_spill] sm:$0xff] %v1828_v48  ;;  %v956_v17 = vmul.f32 %v1822_v10, %v1828_v48 }
0x145c   :  { %v957_v62 = vadd.f32 %v956_v17, %v849_v25 }
0x145e   :  { %v1025_v31 = vadd.f32 %v1024_v21, %v957_v62  ;;  %v203_v21 = vsub.f32 %v1392_v58, %v1406_v4  ;;  %v526_v58 = vsel %vm257_vm8, %v1612_v6, 0.0 }
0x1460   :  { %v1837_v63 = vsub.f32 %v1445_v44, %v1025_v31  ;;  %v205_v62 = vmul.f32 1.442695, %v203_v21 }
0x1462   :  { %v1027_v36 = vsel %vm257_vm8, %v1837_v63, -inf  ;;  %1190 = vpow2.f32 %v205_v62 }
0x1463   :  { %1028 = vmax.xlane.f32.xlu0 %v1027_v36  ;;  %v402_v36 = vsub.f32 %v1513_v46, %v1519_v51  ;;  %v634_v46 = vsel %vm257_vm8, %v1671_v14, 0.0  ;;  %v527_v51 = vrot.slane %v526_v58, 4 }
0x1464   :  { %v635_v62 = vrot.slane %v634_v46, 4 }
0x1466   :  { %v636_v48 = vadd.f32 %v635_v62, %v634_v46 }
0x1468   :  { %v637_v39 = vrot.slane %v636_v48, 2 }
0x146c   :  { %v1191_v31 = vpop.eup %1190 }
0x14f0   :  { %v1841_v12 = vpop.xlane.xlu0 %1028 }
0x14f1   :  { %vm1030_vm10 = vcmp.ge.f32.partialorder %v1837_v63, %v1841_v12 }
0x14f2   :  { %v1031_v45 = vsel %vm1030_vm10, %v1385_v54, 16  ;;  %vm1085_vm10 = vcmp.eq.s32.totalorder %v1385_v54, 7 }
0x14f3   :  { %v1032_v52 = vsel %vm257_vm8, %v1031_v45, 2147483647  ;;  %v403_v45 = vmul.f32 1.442695, %v402_v36  ;;  %v850_v36 = vsel %vm257_vm8, %v1788_v30, 0.0 }
0x14f4   :  { %v1034_v28 = vshra.s32 %v1032_v52, 16  ;;  %v1033_v25 = vand.u32 65535, %v1032_v52  ;;  %v851_v35 = vrot.slane %v850_v36, 4 }
0x14f5   :  { %1192 = vpow2.f32 %v403_v45  ;;  %v528_v45 = vadd.f32 %v527_v51, %v526_v58  ;;  %v638_v51 = vadd.f32 %v637_v39, %v636_v48 }
0x14f6   :  { %v1036_v29 = vcvt.s32.f32 %v1034_v28  ;;  %v1035_v44 = vcvt.s32.f32 %v1033_v25  ;;  %v297_v25 = vsel %vm257_vm8, %v1476_v24, 0.0 }
0x14f7   :  { %v529_v43 = vrot.slane %v528_v45, 2 }
0x14f8   :  { %1037 = vmin.xlane.f32.xlu1 %v1036_v29 }
0x14ff   :  { %v1193_v28 = vpop.eup %1192 }
0x1500   :  { %v405_v52 = vsel %vm257_vm8, %v1193_v28, 0.0 }
0x1585   :  { %v1038_v3 = vpop.xlane.xlu1 %1037 }
0x1586   :  { %vm1039_vm3 = vcmp.eq.f32.partialorder %v1036_v29, %v1038_v3  ;;  %v418_v29 = vsel %vm257_vm8, %v1545_v32, 0.0 }
0x1587   :  { %v1040_v17 = vsel %vm1039_vm3, %v1035_v44, inf  ;;  %v419_v4 = vrot.slane %v418_v29, 4  ;;  %v298_v44 = vrot.slane %v297_v25, 4  ;;  %vm1086_vm3 = vcmp.eq.s32.totalorder %v1385_v54, 15 }
0x1588   :  { %1041 = vmin.xlane.f32.xlu0 %v1040_v17  ;;  %v742_v17 = vsel %vm257_vm8, %v1740_v57, 0.0 }
0x1589   :  { %v420_v21 = vadd.f32 %v419_v4, %v418_v29  ;;  %v743_v28 = vrot.slane %v742_v17, 4  ;;  %v852_v29 = vadd.f32 %v851_v35, %v850_v36 }
0x158b   :  { %v421_v19 = vrot.slane %v420_v21, 2  ;;  %v744_v14 = vadd.f32 %v743_v28, %v742_v17  ;;  %v853_v32 = vrot.slane %v852_v29, 2 }
0x158d   :  { %v422_v55 = vadd.f32 %v421_v19, %v420_v21  ;;  %v745_v2 = vrot.slane %v744_v14, 2  ;;  %v639_v19 = vrot.slane %v638_v51, 1 }
0x158f   :  { %v423_v58 = vrot.slane %v422_v55, 1  ;;  %v746_v17 = vadd.f32 %v745_v2, %v744_v14  ;;  %v640_v21 = vadd.f32 %v639_v19, %v638_v51  ;;  %v204_v51 = vsub.f32 %v1394_v60, %v1409_v5 }
0x1590   :  { %v364_v19 = vsub.f32 %v1435_v41, %v1456_v49  ;;  %v472_v60 = vsub.f32 %v1492_v33, %v1508_v42  ;;  %v688_v41 = vsub.f32 %v1588_v27, %v1594_v20  ;;  %v1050_v27 = vsub.f32 %v1837_v63, %v1841_v12 }
0x1591   :  { %v747_v48 = vrot.slane %v746_v17, 1  ;;  %v859_v63 = vmul.f32 %v1788_v30, %v1366_v9  ;;  %v618_v30 = vsub.f32 %v1633_v34, %v1645_v59 }
0x1592   :  { %v473_v5 = vmul.f32 1.442695, %v472_v60  ;;  %v689_v33 = vmul.f32 1.442695, %v688_v41 }
0x1593   :  { %v860_v12 = vsel %vm257_vm8, %v859_v63, 0.0 }
0x159e   :  { %212 = vperm.xlu0 %1185, %v1191_v31   ;;  %v299_v31 = vadd.f32 %v298_v44, %v297_v25  ;;  %v1044_v25 = vcvt.f32.s32 %v1038_v3  ;;  %v530_v44 = vadd.f32 %v529_v43, %v528_v45  ;;  %v854_v43 = vadd.f32 %v853_v32, %v852_v29 }
0x15a0   :  { %v300_v50 = vrot.slane %v299_v31, 2  ;;  %v1045_v18 = vshll.u32 %v1044_v25, 16  ;;  %v531_v62 = vrot.slane %v530_v44, 1 }
0x15a2   :  { %v301_v4 = vadd.f32 %v300_v50, %v299_v31  ;;  %v424_v50 = vadd.f32 %v423_v58, %v422_v55  ;;  %v532_v2 = vadd.f32 %v531_v62, %v530_v44 }
0x15bd   :  { %406 = vadd.xlane.f32.xlu0 %v405_v52  ;;  %v958_v52 = vsel %vm257_vm8, %v1822_v10, 0.0  ;;  %v302_v10 = vrot.slane %v301_v4, 1 }
0x15be   :  { %v959_v26 = vrot.slane %v958_v52, 4 }
0x15bf   :  { %v303_v39 = vadd.f32 %v302_v10, %v301_v4  ;;  %v748_v10 = vadd.f32 %v747_v48, %v746_v17 }
0x15c0   :  { %v960_v53 = vadd.f32 %v959_v26, %v958_v52  ;;  %v1090_v26 = vsel %vm1085_vm10, %v1771_v37, %v1819_v8  ;;  %v855_v37 = vrot.slane %v854_v43, 1 }
0x15c1   :  { %v425_v3 = vadd.f32 %v424_v50, %v303_v39  ;;  %v281_v50 = vsub.f32 %v1452_v47, %v1461_v13  ;;  %v306_v13 = vmul.f32 %v1476_v24, %v1366_v9 }
0x15c2   :  { %v961_v28 = vrot.slane %v960_v53, 2  ;;  %v856_v52 = vadd.f32 %v855_v37, %v854_v43  ;;  %v751_v37 = vmul.f32 %v1740_v57, %v1366_v9  ;;  %v510_v57 = vsub.f32 %v1570_v1, %v1574_v38 }
0x15c3   :  { %v533_v8 = vadd.f32 %v532_v2, %v425_v3  ;;  %v282_v43 = vmul.f32 1.442695, %v281_v50  ;;  %v307_v42 = vsel %vm257_vm8, %v306_v13, 0.0  ;;  %v2119_v50 = vld [vmem:[#allocation14_spill] sm:$0xff]  ;;  %v2124_v13 = vld [vmem:[#allocation16_spill] sm:$0xff] }
0x15c5   :  { %v641_v45 = vadd.f32 %v640_v21, %v533_v8 }
0x1615   :  { %v1042_v7 = vpop.xlane.xlu0 %1041 }
0x1616   :  { %v1043_v46 = vcvt.f32.s32 %v1042_v7 }
0x1618   :  { %v1046_v35 = vadd.s32 %v1045_v18, %v1043_v46  ;;  %v962_v18 = vadd.f32 %v961_v28, %v960_v53  ;;  %v207_v28 = vmul.f32 1.442695, %v204_v51 }
0x161a   :  { %vm1047_vm7 = vcmp.eq.s32.totalorder %v1385_v54, %v1046_v35  ;;  %v1091_v7 = vsel %vm1086_vm3, %v1046_v35, %v1090_v26  ;;  %v963_v31 = vrot.slane %v962_v18, 1  ;;  %1194 = vpow2.f32 %v207_v28  ;;  %v2118_v28 = vld [vmem:[#allocation10_spill] sm:$0xff] }
0x161b   :  { %v1876_v14 = vsel %vm1047_vm7, 1.0, %v2108_v15  ;;  %1124 = vst [vmem:[#allocation4] sm:$0x3] %v1091_v7  ;;  %v749_v15 = vadd.f32 %v748_v10, %v641_v45  ;;  %vm1092_vm7 = vcmask 130048   ;;  %v365_v26 = vmul.f32 1.442695, %v364_v19 }
0x161c   :  { %v1063_v32 = vsel %vm257_vm8, %v1876_v14, 0.0  ;;  %v964_v4 = vadd.f32 %v963_v31, %v962_v18  ;;  %1196 = vpow2.f32 %v282_v43  ;;  %v726_v7 = vsub.f32 %v1704_v61, %v1712_v16  ;;  %v2120_v19 = vld [vmem:[#allocation13_spill] sm:$0xff] }
0x161d   :  { %v1064_v55 = vrot.slane %v1063_v32, 4  ;;  %v857_v44 = vadd.f32 %v856_v52, %v749_v15  ;;  %1198 = vpow2.f32 %v365_v26  ;;  %v535_v16 = vmul.f32 %v1612_v6, %v1366_v9  ;;  %v213_v15 = vpop.permute.xlu0 %212 }
0x161e   :  { %1200 = vpow2.f32 %v473_v5  ;;  %v727_v47 = vmul.f32 1.442695, %v726_v7  ;;  %v752_v6 = vsel %vm257_vm8, %v751_v37, 0.0  ;;  %v1012_v31 = vsub.f32 %v1726_v23, %v1747_v0  ;;  %v2121_v7 = vld [vmem:[#allocation23_spill] sm:$0xff] }
0x161f   :  { %v1065_v36 = vadd.f32 %v1064_v55, %v1063_v32  ;;  %v965_v58 = vadd.f32 %v964_v4, %v857_v44  ;;  %v536_v20 = vsel %vm257_vm8, %v535_v16, 0.0  ;;  %v1051_v32 = vmul.f32 1.442695, %v1050_v27 }
0x1620   :  { %1202 = vpow2.f32 %v727_v47  ;;  %v511_v45 = vmul.f32 1.442695, %v510_v57  ;;  %v580_v4 = vsub.f32 %v1533_v22, %v1552_v40  ;;  %v220_v1 = vrot.slane %v213_v15, %v1390_v56 }
0x1621   :  { %v1066_v29 = vrot.slane %v1065_v36, 2  ;;  %1204 = vpow2.f32 %v689_v33  ;;  %v796_v43 = vsub.f32 %v2120_v19, %v2119_v50 }
0x1622   :  { %1206 = vpow2.f32 %v1051_v32 }
0x1623   :  { %v1067_v25 = vadd.f32 %v1066_v29, %v1065_v36  ;;  %v1013_v36 = vmul.f32 1.442695, %v1012_v31  ;;  %v2127_v31 = vld [vmem:[#allocation8_spill] sm:$0xff] }
0x1624   :  { %v1195_v35 = vpop.eup %1194  ;;  %v1058_v57 = vmul.f32 %v1876_v14, %v2127_v31 }
0x1625   :  { %v1068_v53 = vrot.slane %v1067_v25, 1  ;;  %1208 = vpow2.f32 %v1013_v36 }
0x1626   :  { %v1197_v39 = vpop.eup %1196  ;;  %1210 = vpow2.f32 %v511_v45  ;;  %v1059_v36 = vsel %vm257_vm8, %v1058_v57, 0.0 }
0x1627   :  { %v1069_v46 = vadd.f32 %v1068_v53, %v1067_v25  ;;  %v284_v2 = vsel %vm257_vm8, %v1197_v39, 0.0  ;;  %v1199_v48 = vpop.eup %1198  ;;  %v619_v25 = vmul.f32 1.442695, %v618_v30  ;;  %v581_v53 = vmul.f32 1.442695, %v580_v4 }
0x1628   :  { %v367_v49 = vsel %vm148_vm2, %v1199_v48, 0.0  ;;  %v1201_v18 = vpop.eup %1200  ;;  %v797_v39 = vmul.f32 1.442695, %v796_v43 }
0x1629   :  { %v1880_v62 = vadd.f32 %v1069_v46, %v965_v58  ;;  %v475_v61 = vsel %vm148_vm2, %v1201_v18, 0.0  ;;  %1212 = vpow2.f32 %v619_v25  ;;  %v2117_v46 = vld [vmem:[#allocation20_spill] sm:$0xff] }
0x162a   :  { %v1203_v24 = vpop.eup %1202  ;;  %1214 = vpow2.f32 %v581_v53 }
0x162b   :  { %v1093_v17 = vsel %vm1092_vm7, %v1880_v62, 0.0  ;;  %v729_v55 = vsel %vm257_vm8, %v1203_v24, 0.0  ;;  %v1205_v3 = vpop.eup %1204 }
0x162c   :  { %1094 = vadd.xlane.f32.xlu1 %v1093_v17  ;;  %v691_v21 = vsel %vm148_vm2, %v1205_v3, 0.0  ;;  %v1207_v8 = vpop.eup %1206 }
0x162d   :  { %v1053_v10 = vsel %vm257_vm8, %v1207_v8, 0.0 }
0x162f   :  { %v1209_v58 = vpop.eup %1208 }
0x1630   :  { %v1211_v40 = vpop.eup %1210  ;;  %v1015_v51 = vsel %vm148_vm2, %v1209_v58, 0.0 }
0x1631   :  { %v513_v17 = vsel %vm257_vm8, %v1211_v40, 0.0 }
0x1633   :  { %v1213_v5 = vpop.eup %1212 }
0x1634   :  { %v621_v41 = vsel %vm257_vm8, %v1213_v5, 0.0  ;;  %v1215_v47 = vpop.eup %1214 }
0x1635   :  { %v583_v18 = vsel %vm148_vm2, %v1215_v47, 0.0 }
0x163d   :  { %215 = vperm.xlu1 %1184, %v1195_v35   ;;  %v427_v35 = vmul.f32 %v2118_v28, %v1366_v9 }
0x1661   :  { %285 = vadd.xlane.f32.xlu1 %v284_v2  ;;  %v2122_v2 = vld [vmem:[#allocation22_spill] sm:$0xff] }
0x1662   :  { %v942_v48 = vsub.f32 %v2122_v2, %v2121_v7 }
0x1665   :  { %368 = vadd.xlane.f32.xlu1 %v367_v49  ;;  %v2123_v49 = vld [vmem:[#allocation18_spill] sm:$0xff] }
0x1666   :  { %v904_v33 = vsub.f32 %v2124_v13, %v2123_v49 }
0x1668   :  { %v905_v27 = vmul.f32 1.442695, %v904_v33 }
0x1669   :  { %308 = vadd.xlane.f32.xlu1 %v307_v42  ;;  %v943_v42 = vmul.f32 1.442695, %v942_v48 }
0x166d   :  { %476 = vadd.xlane.f32.xlu1 %v475_v61  ;;  %v2125_v61 = vld [vmem:[#allocation15_spill] sm:$0xff] }
0x166e   :  { %v643_v16 = vmul.f32 %v2125_v61, %v1366_v9 }
0x1671   :  { %537 = vadd.xlane.f32.xlu1 %v536_v20  ;;  %v644_v20 = vsel %vm257_vm8, %v643_v16, 0.0 }
0x1675   :  { %730 = vadd.xlane.f32.xlu1 %v729_v55 }
0x1679   :  { %692 = vadd.xlane.f32.xlu1 %v691_v21 }
0x167d   :  { %753 = vadd.xlane.f32.xlu1 %v752_v6 }
0x1681   :  { %861 = vadd.xlane.f32.xlu1 %v860_v12  ;;  %v2126_v12 = vld [vmem:[#allocation24_spill] sm:$0xff] }
0x1682   :  { %v967_v8 = vmul.f32 %v2126_v12, %v1366_v9 }
0x1685   :  { %1054 = vadd.xlane.f32.xlu1 %v1053_v10  ;;  %v968_v10 = vsel %vm257_vm8, %v967_v8, 0.0 }
0x16b9   :  { %v1095_v52 = vpop.xlane.xlu1 %1094 }
0x16ba   :  { %v1922_v29 = vmul.f32 0.0625, %v1095_v52 }
0x16bc   :  { %v1098_v23 = vsub.f32 %v1880_v62, %v1922_v29  ;;  %v834_v62 = vsub.f32 %v2117_v46, %v1766_v11  ;;  %v428_v11 = vsel %vm257_vm8, %v427_v35, 0.0 }
0x16bd   :  { %v216_v0 = vpop.permute.xlu1 %215 }
0x16be   :  { %v1099_v38 = vmul.f32 %v1098_v23, %v1098_v23  ;;  %v224_v44 = vrot.slane %v216_v0, %v1390_v56  ;;  %v1072_v56 = vmul.f32 %v1876_v14, %v1366_v9  ;;  %v835_v26 = vmul.f32 1.442695, %v834_v62 }
0x16c0   :  { %v1100_v34 = vsel %vm1092_vm7, %v1099_v38, 0.0  ;;  %v225_v59 = vsel %vm145_vm1, %v224_v44, %v220_v1  ;;  %v1073_v60 = vsel %vm257_vm8, %v1072_v56, 0.0  ;;  %1216 = vpow2.f32 %v835_v26 }
0x16c1   :  { %1101 = vadd.xlane.f32.xlu1 %v1100_v34  ;;  %v227_v22 = vsel %vm148_vm2, %v225_v59, 0.0  ;;  %1218 = vpow2.f32 %v797_v39 }
0x16c2   :  { %228 = vadd.xlane.f32.xlu0 %v227_v22  ;;  %1220 = vpow2.f32 %v943_v42 }
0x16c3   :  { %1222 = vpow2.f32 %v905_v27 }
0x16c5   :  { %1016 = vadd.xlane.f32.xlu1 %v1015_v51 }
0x16c6   :  { %514 = vadd.xlane.f32.xlu0 %v513_v17 }
0x16c9   :  { %1074 = vadd.xlane.f32.xlu1 %v1073_v60 }
0x16ca   :  { %429 = vadd.xlane.f32.xlu0 %v428_v11  ;;  %v1217_v24 = vpop.eup %1216 }
0x16cb   :  { %v837_v32 = vsel %vm257_vm8, %v1217_v24, 0.0  ;;  %v1219_v55 = vpop.eup %1218 }
0x16cc   :  { %v799_v3 = vsel %vm148_vm2, %v1219_v55, 0.0  ;;  %v1221_v21 = vpop.eup %1220 }
0x16cd   :  { %v945_v37 = vsel %vm257_vm8, %v1221_v21, 0.0  ;;  %v1223_v6 = vpop.eup %1222 }
0x16ce   :  { %622 = vadd.xlane.f32.xlu0 %v621_v41  ;;  %v907_v63 = vsel %vm148_vm2, %v1223_v6, 0.0 }
0x16d2   :  { %584 = vadd.xlane.f32.xlu0 %v583_v18 }
0x16d6   :  { %645 = vadd.xlane.f32.xlu0 %v644_v20 }
0x16da   :  { %838 = vadd.xlane.f32.xlu0 %v837_v32 }
0x16de   :  { %800 = vadd.xlane.f32.xlu0 %v799_v3 }
0x16e2   :  { %946 = vadd.xlane.f32.xlu0 %v945_v37 }
0x16e6   :  { %908 = vadd.xlane.f32.xlu0 %v907_v63 }
0x16ea   :  { %969 = vadd.xlane.f32.xlu0 %v968_v10 }
0x16ee   :  { %1060 = vadd.xlane.f32.xlu0 %v1059_v36 }
0x16ef   :  { %1271 = shalt.err (!%p1268_p4)
}
0x16f0   :  { %s1272_s26 = scalar_lea.hbm %s2064_s4, 32 }
0x16f1   :  { %p1273_p5 = scmp.ne.s32.totalorder %s2064_s4, %s1272_s26  ;;  %p1276_p6 = scmp.lt.u32.totalorder %s1272_s26, %s2064_s4 }
0x16f3   :  { %p1278_p7 = pnand %p1276_p6, %p1273_p5 }
0x16f5   :  { %1281 = shalt.err (!%p1278_p7)
}
0x16f6   :  { %1144 = dma.vmem_to_hbm [thread:$0]  %s1142_s22, 32, %s2064_s4, [#allocation5]   ;;  %v286_v9 = vpop.xlane.xlu1 %285  ;;  %v407_v15 = vpop.xlane.xlu0 %406  ;;  %v2128_v53 = vld [vmem:[#allocation11_spill] sm:$0xff]  ;;  %v2129_v59 = vld [vmem:[#allocation9_spill] sm:$0xff]  ;;  %vm311_vm1 = vcmask 1041408   ;;  %v2130_v40 = vld [vmem:[#allocation12_spill] sm:$0xff] }
0x16f7   :  { %1224 = vrcp.f32 %v407_v15  ;;  %v2131_v28 = vld [vmem:[#allocation19_spill] sm:$0xff]  ;;  %v2132_v60 = vld [vmem:[#allocation17_spill] sm:$0xff]  ;;  %v305_v7 = vsub.f32 0.0, %v2129_v59  ;;  %vm2135_vm2 = vcmp.eq.s32.totalorder %v1385_v54, 4  ;;  %vm2136_vm8 = vcmp.eq.s32.totalorder %v1385_v54, 13  ;;  %s1314_s4 = smov [#allocation2]  }
0x16f8   :  { %1226 = vrcp.f32 %v286_v9  ;;  %v2133_v48 = vld [vmem:[#allocation21_spill] sm:$0xff]  ;;  %s1131_s7 = sshll.u32 %s1314_s4, 4  ;;  %s1132_s7 = int_to_ptr.vmem [resolvable:$true] %s1131_s7 }
0x16f9   :  { %v426_v18 = vsub.f32 %v305_v7, %v2128_v53  ;;  %s1282_s8 = scalar_lea.vmem %s1132_s7, 32  ;;  %p1287_p9 = scmp.lt.s32.totalorder %s1132_s7, %s1132_s7 }
0x16fa   :  { %v369_v14 = vpop.xlane.xlu1 %368  ;;  %p1283_p8 = scmp.ne.s32.totalorder %s1132_s7, %s1282_s8  ;;  %p1288_p10 = scmp.lt.s32.totalorder %s1282_s8, %s1282_s8 }
0x16fb   :  { %v534_v55 = vsub.f32 %v426_v18, %v2130_v40 }
0x16fc   :  { %p1289_p11 = por %p1288_p10, %p1287_p9 }
0x16fd   :  { %v642_v10 = vsub.f32 %v534_v55, %v2132_v60  ;;  %v2134_v55 = vld [vmem:[#allocation25_spill] sm:$0xff] }
0x16fe   :  { %v309_v45 = vpop.xlane.xlu1 %308  ;;  %p1290_p12 = pnand %p1289_p11, %p1283_p8 }
0x16ff   :  { %v310_v58 = vmul.f32 %v309_v45, %v2129_v59  ;;  %v750_v15 = vsub.f32 %v642_v10, %v2131_v28 }
0x1701   :  { %v312_v56 = vsel %vm311_vm1, %v310_v58, 0.0  ;;  %v1225_v42 = vpop.eup %1224 }
0x1702   :  { %v477_v30 = vpop.xlane.xlu1 %476  ;;  %v313_v26 = vrot.slane %v312_v56, 4  ;;  %v1227_v27 = vpop.eup %1226  ;;  %v409_v63 = vmin.f32 %v1225_v42, 1.0 }
0x1703   :  { %v288_v31 = vmin.f32 %v1227_v27, 1.0 }
0x1704   :  { %v314_v33 = vadd.f32 %v313_v26, %v312_v56 }
0x1706   :  { %v538_v52 = vpop.xlane.xlu1 %537  ;;  %v315_v12 = vrot.slane %v314_v33, 2 }
0x1707   :  { %v539_v46 = vmul.f32 %v538_v52, %v2130_v40 }
0x1709   :  { %v540_v17 = vsel %vm311_vm1, %v539_v46, 0.0 }
0x170a   :  { %v731_v4 = vpop.xlane.xlu1 %730  ;;  %v541_v5 = vrot.slane %v540_v17, 4 }
0x170c   :  { %v542_v61 = vadd.f32 %v541_v5, %v540_v17 }
0x170e   :  { %v693_v23 = vpop.xlane.xlu1 %692  ;;  %v543_v57 = vrot.slane %v542_v61, 2 }
0x1710   :  { %v544_v58 = vadd.f32 %v543_v57, %v542_v61 }
0x1712   :  { %v754_v1 = vpop.xlane.xlu1 %753  ;;  %v545_v5 = vrot.slane %v544_v58, 1 }
0x1713   :  { %v755_v35 = vmul.f32 %v754_v1, %v2131_v28  ;;  %v442_v1 = vsel %vm441_vm12, %v409_v63, 0.0  ;;  %vm2139_vm12 = vcmp.eq.s32.totalorder %v1385_v54, 6 }
0x1715   :  { %v756_v2 = vsel %vm311_vm1, %v755_v35, 0.0 }
0x1716   :  { %v862_v22 = vpop.xlane.xlu1 %861  ;;  %v757_v20 = vrot.slane %v756_v2, 4 }
0x1717   :  { %v863_v41 = vmul.f32 %v862_v22, %v2133_v48 }
0x1719   :  { %v864_v3 = vsel %vm311_vm1, %v863_v41, 0.0 }
0x171a   :  { %v1055_v50 = vpop.xlane.xlu1 %1054  ;;  %v865_v45 = vrot.slane %v864_v3, 4 }
0x174e   :  { %v1102_v47 = vpop.xlane.xlu1 %1101 }
0x174f   :  { %v229_v25 = vpop.xlane.xlu0 %228  ;;  %v1989_v24 = vmul.f32 0.0625, %v1102_v47 }
0x1753   :  { %v515_v0 = vpop.xlane.xlu0 %514 }
0x1754   :  { %1228 = vrcp.f32 %v515_v0 }
0x1755   :  { %1230 = vrcp.f32 %v229_v25 }
0x1756   :  { %1232 = vrcp.f32 %v369_v14  ;;  %v758_v14 = vadd.f32 %v757_v20, %v756_v2 }
0x1757   :  { %v430_v38 = vpop.xlane.xlu0 %429  ;;  %1234 = vrcp.f32 %v477_v30 }
0x1758   :  { %v431_v34 = vmul.f32 %v430_v38, %v2128_v53  ;;  %v1017_v53 = vpop.xlane.xlu1 %1016  ;;  %v759_v46 = vrot.slane %v758_v14, 2 }
0x175a   :  { %v432_v51 = vsel %vm311_vm1, %v431_v34, 0.0  ;;  %v322_v34 = vsel %vm321_vm14, %v288_v31, 0.0  ;;  %vm1106_vm14 = vcmp.eq.f32.partialorder %v1989_v24, inf }
0x175b   :  { %v623_v44 = vpop.xlane.xlu0 %622  ;;  %v433_v19 = vrot.slane %v432_v51, 4 }
0x175c   :  { %1236 = vrcp.f32 %v623_v44  ;;  %v316_v44 = vadd.f32 %v315_v12, %v314_v33 }
0x175d   :  { %v434_v49 = vadd.f32 %v433_v19, %v432_v51 }
0x175e   :  { %v1229_v32 = vpop.eup %1228 }
0x175f   :  { %v585_v62 = vpop.xlane.xlu0 %584  ;;  %v435_v21 = vrot.slane %v434_v49, 2  ;;  %v1231_v6 = vpop.eup %1230  ;;  %v517_v30 = vmin.f32 %v1229_v32, 1.0 }
0x1760   :  { %1238 = vrcp.f32 %v585_v62  ;;  %v1233_v8 = vpop.eup %1232  ;;  %v866_v62 = vadd.f32 %v865_v45, %v864_v3 }
0x1761   :  { %1240 = vrcp.f32 %v731_v4  ;;  %v1235_v9 = vpop.eup %1234  ;;  %v231_v4 = vmin.f32 %v1231_v6, 1.0  ;;  %v436_v25 = vadd.f32 %v435_v21, %v434_v49  ;;  %v371_v38 = vmin.f32 %v1233_v8, 1.0 }
0x1762   :  { %1242 = vrcp.f32 %v693_v23  ;;  %v479_v59 = vmin.f32 %v1235_v9, 1.0  ;;  %v550_v51 = vsel %vm549_vm15, %v517_v30, 0.0  ;;  %v760_v49 = vadd.f32 %v759_v46, %v758_v14 }
0x1763   :  { %v646_v43 = vpop.xlane.xlu0 %645  ;;  %v323_v28 = vsel %vm320_vm13, %v231_v4, %v322_v34  ;;  %v437_v35 = vrot.slane %v436_v25, 1  ;;  %v443_v26 = vsel %vm440_vm0, %v371_v38, %v442_v1  ;;  %v867_v33 = vrot.slane %v866_v62, 2  ;;  %v1075_v1 = vpop.xlane.xlu1 %1074 }
0x1764   :  { %v647_v11 = vmul.f32 %v646_v43, %v2132_v60  ;;  %v2005_v43 = vsub.f32 %v750_v15, %v2133_v48  ;;  %v317_v60 = vrot.slane %v316_v44, 1  ;;  %v551_v7 = vsel %vm548_vm11, %v479_v59, %v550_v51 }
0x1765   :  { %v438_v42 = vadd.f32 %v437_v35, %v436_v25  ;;  %v761_v10 = vrot.slane %v760_v49, 1  ;;  %v2137_v25 = vld [vmem:[#allocation26_spill] sm:$0xff]  ;;  %vm2138_vm13 = vcmp.eq.s32.totalorder %v1385_v54, 5  ;;  %vm1108_vm0 = vcmp.eq.f32.partialorder %v1989_v24, 0.0 }
0x1766   :  { %v648_v39 = vsel %vm311_vm1, %v647_v11, 0.0  ;;  %v1237_v52 = vpop.eup %1236  ;;  %v318_v27 = vadd.f32 %v317_v60, %v316_v44  ;;  %vm1114_vm11 = vcmp.eq.s32.totalorder %v1385_v54, 16  ;;  %vm1117_vm15 = vcmp.eq.s32.totalorder %v1385_v54, 17 }
0x1767   :  { %v839_v13 = vpop.xlane.xlu0 %838  ;;  %v649_v16 = vrot.slane %v648_v39, 4  ;;  %v625_v56 = vmin.f32 %v1237_v52, 1.0 }
0x1768   :  { %1244 = vrcp.f32 %v839_v13  ;;  %v444_v13 = vadd.f32 %v443_v26, %v323_v28  ;;  %v439_v9 = vadd.f32 %v438_v42, %v318_v27 }
0x1769   :  { %v650_v36 = vadd.f32 %v649_v16, %v648_v39  ;;  %v658_v48 = vsel %vm657_vm5, %v625_v56, 0.0 }
0x176a   :  { %v1239_v0 = vpop.eup %1238  ;;  %v552_v20 = vadd.f32 %v551_v7, %v444_v13  ;;  %v966_v7 = vsub.f32 %v2005_v43, %v2134_v55 }
0x176b   :  { %v801_v37 = vpop.xlane.xlu0 %800  ;;  %v651_v22 = vrot.slane %v650_v36, 2  ;;  %v1241_v40 = vpop.eup %1240 }
0x176c   :  { %1246 = vrcp.f32 %v801_v37  ;;  %v1243_v17 = vpop.eup %1242  ;;  %v733_v39 = vmin.f32 %v1241_v40, 1.0  ;;  %v546_v37 = vadd.f32 %v545_v5, %v544_v58  ;;  %v762_v5 = vadd.f32 %v761_v10, %v760_v49 }
0x176d   :  { %1248 = vrsqrt.f32 %v1989_v24  ;;  %v652_v2 = vadd.f32 %v651_v22, %v650_v36  ;;  %v695_v47 = vmin.f32 %v1243_v17, 1.0  ;;  %v868_v36 = vadd.f32 %v867_v33, %v866_v62 }
0x176e   :  { %1250 = vrcp.f32 %v1055_v50  ;;  %v587_v50 = vmin.f32 %v1239_v0, 1.0  ;;  %v766_v6 = vsel %vm765_vm6, %v733_v39, 0.0  ;;  %v1109_v22 = vand.u32 2147483648, %v1989_v24 }
0x176f   :  { %v947_v23 = vpop.xlane.xlu0 %946  ;;  %v653_v63 = vrot.slane %v652_v2, 1  ;;  %v767_v8 = vsel %vm2135_vm2, %v695_v47, %v766_v6  ;;  %v547_v40 = vadd.f32 %v546_v37, %v439_v9 }
0x1770   :  { %1252 = vrcp.f32 %v947_v23  ;;  %v659_v18 = vsel %vm656_vm4, %v587_v50, %v658_v48  ;;  %vm1120_vm4 = vcmp.eq.s32.totalorder %v1385_v54, 18 }
0x1771   :  { %1254 = vrcp.f32 %v1017_v53  ;;  %v660_v31 = vadd.f32 %v659_v18, %v552_v20  ;;  %v654_v38 = vadd.f32 %v653_v63, %v652_v2 }
0x1772   :  { %v1245_v11 = vpop.eup %1244 }
0x1773   :  { %v909_v19 = vpop.xlane.xlu0 %908  ;;  %v841_v32 = vmin.f32 %v1245_v11, 1.0  ;;  %v768_v59 = vadd.f32 %v767_v8, %v660_v31 }
0x1774   :  { %1256 = vrcp.f32 %v909_v19  ;;  %v655_v19 = vadd.f32 %v654_v38, %v547_v40 }
0x1775   :  { %1258 = vrcp.f32 %v1922_v29  ;;  %v874_v15 = vsel %vm2136_vm8, %v841_v32, 0.0 }
0x1776   :  { %v1247_v41 = vpop.eup %1246 }
0x1777   :  { %v970_v61 = vpop.xlane.xlu0 %969  ;;  %v1249_v16 = vpop.eup %1248  ;;  %v803_v12 = vmin.f32 %v1247_v41, 1.0  ;;  %v869_v41 = vrot.slane %v868_v36, 1 }
0x1778   :  { %v971_v3 = vmul.f32 %v970_v61, %v2134_v55  ;;  %v1251_v21 = vpop.eup %1250  ;;  %v1105_v30 = vmul.f32 %v1249_v16, %v1989_v24  ;;  %v763_v61 = vadd.f32 %v762_v5, %v655_v19 }
0x1779   :  { %v1057_v52 = vmin.f32 %v1251_v21, 1.0  ;;  %v875_v44 = vsel %vm2138_vm13, %v803_v12, %v874_v15  ;;  %v870_v43 = vadd.f32 %v869_v41, %v868_v36 }
0x177a   :  { %v1253_v29 = vpop.eup %1252  ;;  %v972_v57 = vsel %vm311_vm1, %v971_v3, 0.0  ;;  %v1107_v51 = vsel %vm1106_vm14, %v1989_v24, %v1105_v30  ;;  %v876_v17 = vadd.f32 %v875_v44, %v768_v59 }
0x177b   :  { %v973_v14 = vrot.slane %v972_v57, 4  ;;  %v1061_v45 = vpop.xlane.xlu0 %1060  ;;  %v949_v4 = vmin.f32 %v1253_v29, 1.0  ;;  %v1255_v0 = vpop.eup %1254  ;;  %v1110_v2 = vsel %vm1108_vm0, %v1109_v22, %v1107_v51  ;;  %v1087_v47 = vsel %vm1086_vm3, %v1057_v52, 0.0 }
0x177c   :  { %v1062_v23 = vmul.f32 %v1061_v45, %v2137_v25  ;;  %v1019_v56 = vmin.f32 %v1255_v0, 1.0  ;;  %v871_v32 = vadd.f32 %v870_v43, %v763_v61 }
0x177d   :  { %v974_v53 = vadd.f32 %v973_v14, %v972_v57  ;;  %v982_v28 = vsel %vm981_vm9, %v949_v4, 0.0 }
0x177e   :  { %v1257_v34 = vpop.eup %1256  ;;  %v1076_v58 = vmul.f32 %v1075_v1, %v1062_v23  ;;  %v1088_v33 = vsel %vm1085_vm10, %v1019_v56, %v1087_v47  ;;  %v1071_v42 = vsub.f32 %v966_v7, %v1062_v23 }
0x177f   :  { %v911_v46 = vmin.f32 %v1257_v34, 1.0  ;;  %v975_v62 = vrot.slane %v974_v53, 2  ;;  %v1259_v50 = vpop.eup %1258 }
0x1780   :  { %v1077_v35 = vsel %vm311_vm1, %v1076_v58, 0.0  ;;  %v1112_v49 = vmul.f32 %v1259_v50, %v1110_v2  ;;  %v1115_v20 = vsel %vm1114_vm11, %v1071_v42, 0.0 }
0x1781   :  { %v983_v26 = vsel %vm2139_vm12, %v911_v46, %v982_v28  ;;  %v976_v60 = vadd.f32 %v975_v62, %v974_v53  ;;  %v1078_v11 = vrot.slane %v1077_v35, 4 }
0x1782   :  { %v984_v39 = vadd.f32 %v983_v26, %v876_v17  ;;  %v1113_v3 = vmul.f32 100.0, %v1112_v49 }
0x1783   :  { %v977_v13 = vrot.slane %v976_v60, 1  ;;  %v1079_v48 = vadd.f32 %v1078_v11, %v1077_v35 }
0x1784   :  { %v1089_v16 = vadd.f32 %v1088_v33, %v984_v39  ;;  %v1118_v12 = vsel %vm1117_vm15, %v1113_v3, 0.0 }
0x1785   :  { %v1080_v18 = vrot.slane %v1079_v48, 2  ;;  %v978_v27 = vadd.f32 %v977_v13, %v976_v60 }
0x1786   :  { %v1116_v21 = vadd.f32 %v1115_v20, %v1089_v16 }
0x1787   :  { %v1081_v24 = vadd.f32 %v1080_v18, %v1079_v48  ;;  %v979_v37 = vadd.f32 %v978_v27, %v871_v32 }
0x1788   :  { %v1119_v29 = vadd.f32 %v1118_v12, %v1116_v21 }
0x1789   :  { %v1082_v55 = vrot.slane %v1081_v24, 1 }
0x178b   :  { %v1083_v6 = vadd.f32 %v1082_v55, %v1081_v24 }
0x178d   :  { %v1084_v63 = vadd.f32 %v1083_v6, %v979_v37 }
0x178f   :  { %v1121_v8 = vsel %vm1120_vm4, %v1084_v63, 0.0 }
0x1790   :  { %v1122_v10 = vadd.f32 %v1121_v8, %v1119_v29 }
0x1792   :  { %1123 = vst [vmem:[#allocation2] sm:$0x3] %v1122_v10 }
0x1793   :  { %1293 = shalt.err (!%p1290_p12)
}
0x1794   :  { %s1294_s11 = scalar_lea.hbm %s2063_s3, 32 }
0x1795   :  { %p1295_p13 = scmp.ne.s32.totalorder %s2063_s3, %s1294_s11  ;;  %p1298_p0 = scmp.lt.u32.totalorder %s1294_s11, %s2063_s3 }
0x1797   :  { %p1300_p1 = pnand %p1298_p0, %p1295_p13 }
0x1799   :  { %1303 = shalt.err (!%p1300_p1)
}
0x179a   :  { %1134 = dma.vmem_to_hbm [thread:$0]  %s1132_s7, 32, %s2063_s3, [#allocation3]  }
0x179b   :  { %1304 = dma.done.wait [#allocation3], 32  }
0x179c   :  { %1305 = vsyncadd [#allocation3], 4294967264 }
0x179d   :  { %1306 = dma.done.wait [#allocation5], 32  }
0x179e   :  { %1307 = vsyncadd [#allocation5], 4294967264 }
0x179f   :  { %1151 = vsyncpa [#allocation3], 1 }
0x17a0   :  { %1152 = vsyncpa [#allocation5], 1 }

</bundles_post_ra>
